<compile_context>
chip_gen: v7x
topology: tpu7x:2x2x1
jax: 0.10.0
libtpu: 0.0.40
codegen_flags: <defaults>
</compile_context>

<pallas_src>
import functools

import jax
import jax.numpy as jnp
from jax.experimental import pallas as pl
from jax.experimental.pallas import tpu as pltpu


def _relu_conv1x1_kernel(x_ref, w_ref, o_ref, *, use_bf16: bool):
    # x_ref: (C_in, tile_p) f32 activation tile for one (batch, spatial-tile) grid point
    # w_ref: (C_out, C_in)  weight (bf16 when use_bf16), resident across the whole grid
    # o_ref: (C_out, tile_p) f32 output tile
    x = x_ref[...]
    if use_bf16:
        # Cast before the ReLU (identical result, half the vreg traffic on v6e/v7x bf16 VALUs;
        # Mosaic still lowers it correctly on v5e).  Weight arrives pre-cast from the wrapper.
        x = x.astype(jnp.bfloat16)
    x = jnp.maximum(x, 0)  # fused ReLU on the VPU
    o_ref[...] = jnp.dot(w_ref[...], x,
                         preferred_element_type=jnp.float32).astype(o_ref.dtype)


def _round_up(v: int, m: int) -> int:
    return ((v + m - 1) // m) * m


def relu_conv1x1(x_nchw: jax.Array, weight_oihw: jax.Array,
                 *, tile_p: int = 512, use_bf16: bool = True) -> jax.Array:
    """ReLU followed by a 1x1 conv (stride 1, no bias), matching nn.Conv2d semantics.

    x_nchw:      (N, C_in, H, W)
    weight_oihw: (C_out, C_in, 1, 1)   -- PyTorch conv weight layout
    returns:     (N, C_out, H, W) in x_nchw.dtype
    """
    n, c_in, h, w = x_nchw.shape
    c_out = weight_oihw.shape[0]
    hw = h * w

    # Zero-copy reshapes only -- no transposes in the wrapper.
    x_mat = x_nchw.reshape(n, c_in, hw)                 # (N, C_in, HW)
    w_mat = weight_oihw.reshape(c_out, c_in)            # (C_out, C_in), used as LHS
    if use_bf16:
        # One-time cast outside the hot loop: halves the resident-weight HBM transfer
        # and keeps the MXU on the single-pass bf16 path.  Accumulation stays f32.
        w_mat = w_mat.astype(jnp.bfloat16)

    # Spatial tiling: >= 128 lanes per tile (per-step grid overhead ~0.35us), and at least
    # two tiles whenever HW allows so the pipeline overlaps DMA/compute/writeback and the
    # "parallel" grid can be sharded across v7x's two TensorCores.
    tp = max(128, min(tile_p, _round_up(pl.cdiv(hw, 2), 128)))
    grid_p = pl.cdiv(hw, tp)

    kernel = functools.partial(_relu_conv1x1_kernel, use_bf16=use_bf16)
    w_bytes = 2 if use_bf16 else 4

    out = pl.pallas_call(
        kernel,
        # Unpadded output: Pallas emits a masked edge store for the ragged last tile,
        # which is cheaper than a padded output plus a separate XLA slice epilogue.
        out_shape=jax.ShapeDtypeStruct((n, c_out, hw), x_nchw.dtype),
        grid_spec=pl.GridSpec(
            grid=(n, grid_p),
            in_specs=[
                # (1, C_in, tile_p) activation tile; batch dim squeezed away.
                pl.BlockSpec((pl.Squeezed(), c_in, tp), lambda b, p: (b, 0, p)),
                # Full weight, constant index -> stays resident in VMEM across the grid.
                # (pipeline_mode=pl.Buffered(1) would drop its second VMEM buffer; left at
                #  the default here since the ~0.5 MiB of headroom is irrelevant at this size.)
                pl.BlockSpec((c_out, c_in), lambda b, p: (0, 0)),
            ],
            out_specs=pl.BlockSpec((pl.Squeezed(), c_out, tp), lambda b, p: (b, 0, p)),
        ),
        compiler_params=pltpu.CompilerParams(
            # Both axes independent -> v7x's 2 TensorCores can split the (n, grid_p) grid.
            dimension_semantics=("parallel", "parallel"),
            # Explicit scoped-VMEM limit so reuse at larger HW/N/tile_p doesn't silently
            # overrun v7x's smaller (64 MiB physical) VMEM.
            vmem_limit_bytes=32 * 1024 * 1024,
        ),
        cost_estimate=pl.CostEstimate(
            flops=2 * n * hw * c_in * c_out,
            transcendentals=0,
            bytes_accessed=(4 * n * hw * c_in          # f32 activations in
                            + w_bytes * c_in * c_out   # (bf16) weight in
                            + 4 * n * hw * c_out),     # f32 output out
        ),
    )(x_mat, w_mat)

    # Pure reshape back to NCHW (no slice, no transpose).
    return out.reshape(n, c_out, h, w)


if __name__ == "__main__":
    key = jax.random.PRNGKey(0)
    k_x, k_w = jax.random.split(key)

    # Shapes implied by M.forward: x269 ~ (1, 1024, 14, 14), Conv2d(1024, 256, 1x1, bias=False).
    n, c_in, h, w = 1, 1024, 14, 14
    c_out = 256

    x = jax.random.normal(k_x, (n, c_in, h, w), dtype=jnp.float32)
    # Deterministic synthetic weights (kaiming-ish scale), no checkpoint load.
    weight = jax.random.normal(k_w, (c_out, c_in, 1, 1), dtype=jnp.float32) * (1.0 / (c_in ** 0.5))

    # f32 reference of ReLU + 1x1 conv (matches the PyTorch module).
    x_relu = jnp.maximum(x, 0.0)
    w2d = weight.reshape(c_out, c_in)
    ref_f32 = jnp.einsum("ncp,oc->nop", x_relu.reshape(n, c_in, h * w), w2d,
                         preferred_element_type=jnp.float32).reshape(n, c_out, h, w)

    # Exact-precision path: f32 operands inside the kernel, tight tolerance.
    out_f32 = jax.block_until_ready(relu_conv1x1(x, weight, use_bf16=False))
    assert out_f32.shape == (n, c_out, h, w)
    assert jnp.allclose(out_f32, ref_f32, atol=1e-3, rtol=1e-3)

    # Default fast path: bf16 operands, f32 accumulation; compare against a matching
    # bf16 reference (bf16 only carries ~3 significant digits over a K=1024 contraction).
    out_bf16 = jax.block_until_ready(relu_conv1x1(x, weight))
    ref_bf16 = jnp.einsum(
        "ncp,oc->nop",
        x_relu.reshape(n, c_in, h * w).astype(jnp.bfloat16),
        w2d.astype(jnp.bfloat16),
        preferred_element_type=jnp.float32,
    ).astype(jnp.float32).reshape(n, c_out, h, w)
    assert out_bf16.shape == (n, c_out, h, w)
    assert jnp.allclose(out_bf16, ref_bf16, atol=2e-2, rtol=2e-2)

    print("KERNEL_OK")
</pallas_src>

<mosaic_0001>
module attributes {stable_mosaic.version = 11 : i64} {
  func.func @_relu_conv1x1_kernel(%arg0: i32, %arg1: i32, %arg2: memref<1x1024x128xf32, #tpu.memory_space<vmem>>, %arg3: memref<256x1024xf32, #tpu.memory_space<vmem>>, %arg4: memref<1x256x128xf32, #tpu.memory_space<vmem>>) attributes {dimension_semantics = [#tpu.dimension_semantics<parallel>, #tpu.dimension_semantics<parallel>], iteration_bounds = array<i64: 1, 2>, scalar_prefetch = 0 : i64, scratch_operands = 0 : i64, tpu.core_type = #tpu.core_type<tc>, window_params = [{transform_indices = @transform_0, window_bounds = array<i64: 1, 1024, 128>}, {pipeline_mode = #tpu.pipeline_mode<synchronous>, transform_indices = @transform_1, window_bounds = array<i64: 256, 1024>}, {transform_indices = @transform_2, window_bounds = array<i64: 1, 256, 128>}]} {
    %c0 = arith.constant 0 : index
    %c0_0 = arith.constant 0 : index
    %c0_1 = arith.constant 0 : index
    %0 = vector.load %arg2[%c0, %c0_0, %c0_1] : memref<1x1024x128xf32, #tpu.memory_space<vmem>>, vector<1x1024x128xf32>
    %1 = vector.shape_cast %0 : vector<1x1024x128xf32> to vector<1024x128xf32>
    %cst = arith.constant 0.000000e+00 : f32
    %2 = vector.broadcast %cst : f32 to vector<1024x128xf32>
    %3 = arith.maximumf %1, %2 : vector<1024x128xf32>
    %c0_2 = arith.constant 0 : index
    %c0_3 = arith.constant 0 : index
    %4 = vector.load %arg3[%c0_2, %c0_3] : memref<256x1024xf32, #tpu.memory_space<vmem>>, vector<256x1024xf32>
    %cst_4 = arith.constant dense<0.000000e+00> : vector<256x128xf32>
    %5 = tpu.matmul %4, %3, %cst_4 {dimension_numbers = #tpu.dot_dimension_numbers<[1], [0], [0], [1], [0, 0, 1, 1], [], []>} : vector<256x1024xf32>, vector<1024x128xf32>, vector<256x128xf32> -> vector<256x128xf32>
    %c0_5 = arith.constant 0 : index
    %c0_6 = arith.constant 0 : index
    %c0_7 = arith.constant 0 : index
    %6 = vector.load %arg4[%c0_5, %c0_6, %c0_7] : memref<1x256x128xf32, #tpu.memory_space<vmem>>, vector<1x256x128xf32>
    %7 = vector.shape_cast %6 : vector<1x256x128xf32> to vector<256x128xf32>
    %8 = vector.shape_cast %5 : vector<256x128xf32> to vector<1x256x128xf32>
    tpu.vector_store %arg4[%c0_5, %c0_6, %c0_7], %8 {strides = array<i32>} : memref<1x256x128xf32, #tpu.memory_space<vmem>>, vector<1x256x128xf32>,
    return
  }
  func.func @transform_0(%arg0: i32, %arg1: i32) -> (i32, i32, i32) {
    %c0_i32 = arith.constant 0 : i32
    %c0_i32_0 = arith.constant 0 : i32
    return %arg0, %c0_i32, %arg1 : i32, i32, i32
  }
  func.func @transform_1(%arg0: i32, %arg1: i32) -> (i32, i32) {
    %c0_i32 = arith.constant 0 : i32
    %c0_i32_0 = arith.constant 0 : i32
    %c0_i32_1 = arith.constant 0 : i32
    return %c0_i32, %c0_i32_0 : i32, i32
  }
  func.func @transform_2(%arg0: i32, %arg1: i32) -> (i32, i32, i32) {
    %c0_i32 = arith.constant 0 : i32
    %c0_i32_0 = arith.constant 0 : i32
    return %arg0, %c0_i32, %arg1 : i32, i32, i32
  }
}

</mosaic_0001>

<bundles_post_ra>
// kernel: tpu_custom_call.1
= control target key start
LH: loop header
LB: loop body
LE: loop exit
PB: predicated region body
PF: predicated region fallthrough
CT: control target
= control target key end

     0   :  { %s2840_s9 = smov 0   ;;  %s2842_s10 = smov 0   ;;  %s4238_s0 = inlined_call_operand.vmem [shape: f32[1,1024,196], index: 0, kind: input, shape index: {}]   ;;  %s4239_s1 = inlined_call_operand.vmem [shape: f32[256,1024], index: 1, kind: input, shape index: {}]   ;;  %s4240_s2 = inlined_call_operand.vmem [shape: f32[1,256,196], index: 2, kind: output, shape index: {}]  }
   0x1   :  { %s2844_s11 = smov 0   ;;  %s2846_s12 = smov 0  }
   0x2   :  { %s2848_s13 = smov 0  }
   0x3 LB: > { %s21_s14 = sadd.s32 1, %s2818_s12  ;;  %s2378_s15 = sadd.s32 4294967295, %s2822_s13   ;;  %s2822_s13 = sphi %s2848_s13, %s12_s13   ;;  %s2818_s12 = sphi %s2846_s12, %s4245_s12   ;;  %s2814_s11 = sphi %s2844_s11, %s4244_s11   ;;  %s2810_s10 = sphi %s2842_s10, %s4243_s10   ;;  %s2806_s9 = sphi %s2840_s9, %s4242_s9  }
   0x4   : > { %p22_p0 = scmp.ge.s32.totalorder %s21_s14, 2  ;;  %p40_p1 = scmp.ne.s32.totalorder %s2810_s10, %s2806_s9 }
   0x5   : > { %p41_p2 = scmp.eq.s32.totalorder %s2822_s13, 0  ;;  %p93_p4 = scmp.eq.s32.totalorder %s2378_s15, 1 }
   0x6   : > { %s4247_s14 = smov (%p22_p0, %s21_s14), 0  ;;  %s33_s17 = sadd.s32 1, %s2810_s10 }
   0x7   : > { %p42_p3 = por %p41_p2, %p40_p1  ;;  %s29_s16 = ssub.s32 %s2818_s12, %s4247_s14 }
   0x8   : > { %p31_p5 = scmp.eq.s32.totalorder %s29_s16, 0  ;;  %p2875_p6 = por %p93_p4, %p40_p1 }
   0x9   : > { %p2381_p7 = scmp.ge.s32.totalorder %s2822_s13, 2 }
   0xa   : > { %s2880_s19 = scalar_select %p31_p5, %s2810_s10, %s33_s17  }
   0xb   : > { %118 = sbr.rel (%p2381_p7) target bundleno = 86 (0x56), region = 20 }
  0x12   : > { %121 = sbr.rel (!%p42_p3) target bundleno = 86 (0x56), region = 24  ;;  %s123_s20 = sand.u32 (%p42_p3), 1, %s2810_s10  }
  0x13   : > { %s2383_s21 = sshll.u32 (%p42_p3), %s2818_s12, 3  ;;  %s2382_s22 = sshll.u32 (%p42_p3), %s123_s20, 10 }
  0x14   : > { %s2888_s25 = scalar_lea.vmem (%p42_p3), %s4238_s0, %s2383_s21  ;;  %s2893_s26 = scalar_lea.vmem (%p42_p3), [#allocation2], %s2382_s22 }
  0x15   : > { %v411_v0 = vld [vmem:[%s2888_s25] sm:$0xff] (%p42_p3)  ;;  %v413_v1 = vld [vmem:[%s2888_s25 + $0x10] sm:$0xff] (%p42_p3) }
  0x16   : > { %v415_v2 = vld [vmem:[%s2888_s25 + $0x20] sm:$0xff] (%p42_p3)  ;;  %412 = vst [vmem:[%s2893_s26] sm:$0xff] (%p42_p3), %v411_v0  ;;  %414 = vst [vmem:[%s2893_s26 + $0x8] sm:$0xff] (%p42_p3), %v413_v1  ;;  %v417_v3 = vld [vmem:[%s2888_s25 + $0x30] sm:$0xff] (%p42_p3) }
  0x17   : > { %416 = vst [vmem:[%s2893_s26 + $0x10] sm:$0xff] (%p42_p3), %v415_v2  ;;  %v419_v4 = vld [vmem:[%s2888_s25 + $0x40] sm:$0xff] (%p42_p3)  ;;  %v421_v5 = vld [vmem:[%s2888_s25 + $0x50] sm:$0xff] (%p42_p3)  ;;  %418 = vst [vmem:[%s2893_s26 + $0x18] sm:$0xff] (%p42_p3), %v417_v3 }
  0x18   : > { %420 = vst [vmem:[%s2893_s26 + $0x20] sm:$0xff] (%p42_p3), %v419_v4  ;;  %422 = vst [vmem:[%s2893_s26 + $0x28] sm:$0xff] (%p42_p3), %v421_v5  ;;  %v423_v6 = vld [vmem:[%s2888_s25 + $0x60] sm:$0xff] (%p42_p3)  ;;  %v425_v7 = vld [vmem:[%s2888_s25 + $0x70] sm:$0xff] (%p42_p3) }
  0x19   : > { %v427_v8 = vld [vmem:[%s2888_s25 + $0x80] sm:$0xff]  ;;  %424 = vst [vmem:[%s2893_s26 + $0x30] sm:$0xff] %v423_v6  ;;  %426 = vst [vmem:[%s2893_s26 + $0x38] sm:$0xff] %v425_v7  ;;  %v429_v9 = vld [vmem:[%s2888_s25 + $0x90] sm:$0xff] }
  0x1a   : > { %428 = vst [vmem:[%s2893_s26 + $0x40] sm:$0xff] %v427_v8  ;;  %v431_v10 = vld [vmem:[%s2888_s25 + $0xa0] sm:$0xff]  ;;  %v433_v11 = vld [vmem:[%s2888_s25 + $0xb0] sm:$0xff]  ;;  %430 = vst [vmem:[%s2893_s26 + $0x48] sm:$0xff] %v429_v9 }
  0x1b   : > { %432 = vst [vmem:[%s2893_s26 + $0x50] sm:$0xff] %v431_v10  ;;  %434 = vst [vmem:[%s2893_s26 + $0x58] sm:$0xff] %v433_v11  ;;  %v435_v12 = vld [vmem:[%s2888_s25 + $0xc0] sm:$0xff]  ;;  %v437_v13 = vld [vmem:[%s2888_s25 + $0xd0] sm:$0xff] }
  0x1c   : > { %v439_v14 = vld [vmem:[%s2888_s25 + $0xe0] sm:$0xff]  ;;  %436 = vst [vmem:[%s2893_s26 + $0x60] sm:$0xff] %v435_v12  ;;  %438 = vst [vmem:[%s2893_s26 + $0x68] sm:$0xff] %v437_v13  ;;  %v441_v15 = vld [vmem:[%s2888_s25 + $0xf0] sm:$0xff] }
  0x1d   : > { %440 = vst [vmem:[%s2893_s26 + $0x70] sm:$0xff] %v439_v14  ;;  %v443_v16 = vld [vmem:[%s2888_s25 + $0x100] sm:$0xff]  ;;  %v445_v17 = vld [vmem:[%s2888_s25 + $0x110] sm:$0xff]  ;;  %442 = vst [vmem:[%s2893_s26 + $0x78] sm:$0xff] %v441_v15 }
  0x1e   : > { %444 = vst [vmem:[%s2893_s26 + $0x80] sm:$0xff] %v443_v16  ;;  %446 = vst [vmem:[%s2893_s26 + $0x88] sm:$0xff] %v445_v17  ;;  %v447_v18 = vld [vmem:[%s2888_s25 + $0x120] sm:$0xff]  ;;  %v449_v19 = vld [vmem:[%s2888_s25 + $0x130] sm:$0xff] }
  0x1f   : > { %v451_v20 = vld [vmem:[%s2888_s25 + $0x140] sm:$0xff]  ;;  %448 = vst [vmem:[%s2893_s26 + $0x90] sm:$0xff] %v447_v18  ;;  %450 = vst [vmem:[%s2893_s26 + $0x98] sm:$0xff] %v449_v19  ;;  %v453_v21 = vld [vmem:[%s2888_s25 + $0x150] sm:$0xff] }
  0x20   : > { %452 = vst [vmem:[%s2893_s26 + $0xa0] sm:$0xff] %v451_v20  ;;  %v455_v22 = vld [vmem:[%s2888_s25 + $0x160] sm:$0xff]  ;;  %v457_v23 = vld [vmem:[%s2888_s25 + $0x170] sm:$0xff]  ;;  %454 = vst [vmem:[%s2893_s26 + $0xa8] sm:$0xff] %v453_v21 }
  0x21   : > { %456 = vst [vmem:[%s2893_s26 + $0xb0] sm:$0xff] %v455_v22  ;;  %458 = vst [vmem:[%s2893_s26 + $0xb8] sm:$0xff] %v457_v23  ;;  %v459_v24 = vld [vmem:[%s2888_s25 + $0x180] sm:$0xff]  ;;  %v461_v25 = vld [vmem:[%s2888_s25 + $0x190] sm:$0xff] }
  0x22   : > { %v463_v26 = vld [vmem:[%s2888_s25 + $0x1a0] sm:$0xff]  ;;  %460 = vst [vmem:[%s2893_s26 + $0xc0] sm:$0xff] %v459_v24  ;;  %462 = vst [vmem:[%s2893_s26 + $0xc8] sm:$0xff] %v461_v25  ;;  %v465_v27 = vld [vmem:[%s2888_s25 + $0x1b0] sm:$0xff] }
  0x23   : > { %464 = vst [vmem:[%s2893_s26 + $0xd0] sm:$0xff] %v463_v26  ;;  %v467_v28 = vld [vmem:[%s2888_s25 + $0x1c0] sm:$0xff]  ;;  %v469_v29 = vld [vmem:[%s2888_s25 + $0x1d0] sm:$0xff]  ;;  %466 = vst [vmem:[%s2893_s26 + $0xd8] sm:$0xff] %v465_v27 }
  0x24   : > { %468 = vst [vmem:[%s2893_s26 + $0xe0] sm:$0xff] %v467_v28  ;;  %470 = vst [vmem:[%s2893_s26 + $0xe8] sm:$0xff] %v469_v29  ;;  %v471_v30 = vld [vmem:[%s2888_s25 + $0x1e0] sm:$0xff]  ;;  %v473_v31 = vld [vmem:[%s2888_s25 + $0x1f0] sm:$0xff] }
  0x25   : > { %v475_v32 = vld [vmem:[%s2888_s25 + $0x200] sm:$0xff]  ;;  %472 = vst [vmem:[%s2893_s26 + $0xf0] sm:$0xff] %v471_v30  ;;  %474 = vst [vmem:[%s2893_s26 + $0xf8] sm:$0xff] %v473_v31  ;;  %v477_v33 = vld [vmem:[%s2888_s25 + $0x210] sm:$0xff] }
  0x26   : > { %476 = vst [vmem:[%s2893_s26 + $0x100] sm:$0xff] %v475_v32  ;;  %v479_v34 = vld [vmem:[%s2888_s25 + $0x220] sm:$0xff]  ;;  %v481_v35 = vld [vmem:[%s2888_s25 + $0x230] sm:$0xff]  ;;  %478 = vst [vmem:[%s2893_s26 + $0x108] sm:$0xff] %v477_v33 }
  0x27   : > { %480 = vst [vmem:[%s2893_s26 + $0x110] sm:$0xff] %v479_v34  ;;  %482 = vst [vmem:[%s2893_s26 + $0x118] sm:$0xff] %v481_v35  ;;  %v483_v36 = vld [vmem:[%s2888_s25 + $0x240] sm:$0xff]  ;;  %v485_v37 = vld [vmem:[%s2888_s25 + $0x250] sm:$0xff] }
  0x28   : > { %v487_v38 = vld [vmem:[%s2888_s25 + $0x260] sm:$0xff]  ;;  %484 = vst [vmem:[%s2893_s26 + $0x120] sm:$0xff] %v483_v36  ;;  %486 = vst [vmem:[%s2893_s26 + $0x128] sm:$0xff] %v485_v37  ;;  %v489_v39 = vld [vmem:[%s2888_s25 + $0x270] sm:$0xff] }
  0x29   : > { %488 = vst [vmem:[%s2893_s26 + $0x130] sm:$0xff] %v487_v38  ;;  %v491_v40 = vld [vmem:[%s2888_s25 + $0x280] sm:$0xff]  ;;  %v493_v41 = vld [vmem:[%s2888_s25 + $0x290] sm:$0xff]  ;;  %490 = vst [vmem:[%s2893_s26 + $0x138] sm:$0xff] %v489_v39 }
  0x2a   : > { %492 = vst [vmem:[%s2893_s26 + $0x140] sm:$0xff] %v491_v40  ;;  %494 = vst [vmem:[%s2893_s26 + $0x148] sm:$0xff] %v493_v41  ;;  %v495_v42 = vld [vmem:[%s2888_s25 + $0x2a0] sm:$0xff]  ;;  %v497_v43 = vld [vmem:[%s2888_s25 + $0x2b0] sm:$0xff] }
  0x2b   : > { %v499_v44 = vld [vmem:[%s2888_s25 + $0x2c0] sm:$0xff]  ;;  %496 = vst [vmem:[%s2893_s26 + $0x150] sm:$0xff] %v495_v42  ;;  %498 = vst [vmem:[%s2893_s26 + $0x158] sm:$0xff] %v497_v43  ;;  %v501_v45 = vld [vmem:[%s2888_s25 + $0x2d0] sm:$0xff] }
  0x2c   : > { %500 = vst [vmem:[%s2893_s26 + $0x160] sm:$0xff] %v499_v44  ;;  %v503_v46 = vld [vmem:[%s2888_s25 + $0x2e0] sm:$0xff]  ;;  %v505_v47 = vld [vmem:[%s2888_s25 + $0x2f0] sm:$0xff]  ;;  %502 = vst [vmem:[%s2893_s26 + $0x168] sm:$0xff] %v501_v45 }
  0x2d   : > { %504 = vst [vmem:[%s2893_s26 + $0x170] sm:$0xff] %v503_v46  ;;  %506 = vst [vmem:[%s2893_s26 + $0x178] sm:$0xff] %v505_v47  ;;  %v507_v48 = vld [vmem:[%s2888_s25 + $0x300] sm:$0xff]  ;;  %v509_v49 = vld [vmem:[%s2888_s25 + $0x310] sm:$0xff] }
  0x2e   : > { %v511_v50 = vld [vmem:[%s2888_s25 + $0x320] sm:$0xff]  ;;  %508 = vst [vmem:[%s2893_s26 + $0x180] sm:$0xff] %v507_v48  ;;  %510 = vst [vmem:[%s2893_s26 + $0x188] sm:$0xff] %v509_v49  ;;  %v513_v51 = vld [vmem:[%s2888_s25 + $0x330] sm:$0xff] }
  0x2f   : > { %512 = vst [vmem:[%s2893_s26 + $0x190] sm:$0xff] %v511_v50  ;;  %v515_v52 = vld [vmem:[%s2888_s25 + $0x340] sm:$0xff]  ;;  %v517_v53 = vld [vmem:[%s2888_s25 + $0x350] sm:$0xff]  ;;  %514 = vst [vmem:[%s2893_s26 + $0x198] sm:$0xff] %v513_v51 }
  0x30   : > { %516 = vst [vmem:[%s2893_s26 + $0x1a0] sm:$0xff] %v515_v52  ;;  %518 = vst [vmem:[%s2893_s26 + $0x1a8] sm:$0xff] %v517_v53  ;;  %v519_v54 = vld [vmem:[%s2888_s25 + $0x360] sm:$0xff]  ;;  %v521_v55 = vld [vmem:[%s2888_s25 + $0x370] sm:$0xff] }
  0x31   : > { %v523_v56 = vld [vmem:[%s2888_s25 + $0x380] sm:$0xff]  ;;  %520 = vst [vmem:[%s2893_s26 + $0x1b0] sm:$0xff] %v519_v54  ;;  %522 = vst [vmem:[%s2893_s26 + $0x1b8] sm:$0xff] %v521_v55  ;;  %v525_v57 = vld [vmem:[%s2888_s25 + $0x390] sm:$0xff] }
  0x32   : > { %524 = vst [vmem:[%s2893_s26 + $0x1c0] sm:$0xff] %v523_v56  ;;  %v527_v58 = vld [vmem:[%s2888_s25 + $0x3a0] sm:$0xff]  ;;  %v529_v59 = vld [vmem:[%s2888_s25 + $0x3b0] sm:$0xff]  ;;  %526 = vst [vmem:[%s2893_s26 + $0x1c8] sm:$0xff] %v525_v57 }
  0x33   : > { %528 = vst [vmem:[%s2893_s26 + $0x1d0] sm:$0xff] %v527_v58  ;;  %530 = vst [vmem:[%s2893_s26 + $0x1d8] sm:$0xff] %v529_v59  ;;  %v531_v60 = vld [vmem:[%s2888_s25 + $0x3c0] sm:$0xff]  ;;  %v533_v61 = vld [vmem:[%s2888_s25 + $0x3d0] sm:$0xff] }
  0x34   : > { %v535_v62 = vld [vmem:[%s2888_s25 + $0x3e0] sm:$0xff]  ;;  %532 = vst [vmem:[%s2893_s26 + $0x1e0] sm:$0xff] %v531_v60  ;;  %534 = vst [vmem:[%s2893_s26 + $0x1e8] sm:$0xff] %v533_v61  ;;  %v537_v63 = vld [vmem:[%s2888_s25 + $0x3f0] sm:$0xff] }
  0x35   : > { %536 = vst [vmem:[%s2893_s26 + $0x1f0] sm:$0xff] %v535_v62  ;;  %v539_v0 = vld [vmem:[%s2888_s25 + $0x400] sm:$0xff]  ;;  %v541_v1 = vld [vmem:[%s2888_s25 + $0x410] sm:$0xff]  ;;  %538 = vst [vmem:[%s2893_s26 + $0x1f8] sm:$0xff] %v537_v63 }
  0x36   : > { %540 = vst [vmem:[%s2893_s26 + $0x200] sm:$0xff] %v539_v0  ;;  %542 = vst [vmem:[%s2893_s26 + $0x208] sm:$0xff] %v541_v1  ;;  %v543_v2 = vld [vmem:[%s2888_s25 + $0x420] sm:$0xff]  ;;  %v545_v3 = vld [vmem:[%s2888_s25 + $0x430] sm:$0xff] }
  0x37   : > { %v547_v4 = vld [vmem:[%s2888_s25 + $0x440] sm:$0xff]  ;;  %544 = vst [vmem:[%s2893_s26 + $0x210] sm:$0xff] %v543_v2  ;;  %546 = vst [vmem:[%s2893_s26 + $0x218] sm:$0xff] %v545_v3  ;;  %v549_v5 = vld [vmem:[%s2888_s25 + $0x450] sm:$0xff] }
  0x38   : > { %548 = vst [vmem:[%s2893_s26 + $0x220] sm:$0xff] %v547_v4  ;;  %v551_v6 = vld [vmem:[%s2888_s25 + $0x460] sm:$0xff]  ;;  %v553_v7 = vld [vmem:[%s2888_s25 + $0x470] sm:$0xff]  ;;  %550 = vst [vmem:[%s2893_s26 + $0x228] sm:$0xff] %v549_v5 }
  0x39   : > { %552 = vst [vmem:[%s2893_s26 + $0x230] sm:$0xff] %v551_v6  ;;  %554 = vst [vmem:[%s2893_s26 + $0x238] sm:$0xff] %v553_v7  ;;  %v555_v8 = vld [vmem:[%s2888_s25 + $0x480] sm:$0xff]  ;;  %v557_v9 = vld [vmem:[%s2888_s25 + $0x490] sm:$0xff] }
  0x3a   : > { %v559_v10 = vld [vmem:[%s2888_s25 + $0x4a0] sm:$0xff]  ;;  %556 = vst [vmem:[%s2893_s26 + $0x240] sm:$0xff] %v555_v8  ;;  %558 = vst [vmem:[%s2893_s26 + $0x248] sm:$0xff] %v557_v9  ;;  %v561_v11 = vld [vmem:[%s2888_s25 + $0x4b0] sm:$0xff] }
  0x3b   : > { %560 = vst [vmem:[%s2893_s26 + $0x250] sm:$0xff] %v559_v10  ;;  %v563_v12 = vld [vmem:[%s2888_s25 + $0x4c0] sm:$0xff]  ;;  %v565_v13 = vld [vmem:[%s2888_s25 + $0x4d0] sm:$0xff]  ;;  %562 = vst [vmem:[%s2893_s26 + $0x258] sm:$0xff] %v561_v11 }
  0x3c   : > { %564 = vst [vmem:[%s2893_s26 + $0x260] sm:$0xff] %v563_v12  ;;  %566 = vst [vmem:[%s2893_s26 + $0x268] sm:$0xff] %v565_v13  ;;  %v567_v14 = vld [vmem:[%s2888_s25 + $0x4e0] sm:$0xff]  ;;  %v569_v15 = vld [vmem:[%s2888_s25 + $0x4f0] sm:$0xff] }
  0x3d   : > { %v571_v16 = vld [vmem:[%s2888_s25 + $0x500] sm:$0xff]  ;;  %568 = vst [vmem:[%s2893_s26 + $0x270] sm:$0xff] %v567_v14  ;;  %570 = vst [vmem:[%s2893_s26 + $0x278] sm:$0xff] %v569_v15  ;;  %v573_v17 = vld [vmem:[%s2888_s25 + $0x510] sm:$0xff] }
  0x3e   : > { %572 = vst [vmem:[%s2893_s26 + $0x280] sm:$0xff] %v571_v16  ;;  %v575_v18 = vld [vmem:[%s2888_s25 + $0x520] sm:$0xff]  ;;  %v577_v19 = vld [vmem:[%s2888_s25 + $0x530] sm:$0xff]  ;;  %574 = vst [vmem:[%s2893_s26 + $0x288] sm:$0xff] %v573_v17 }
  0x3f   : > { %576 = vst [vmem:[%s2893_s26 + $0x290] sm:$0xff] %v575_v18  ;;  %578 = vst [vmem:[%s2893_s26 + $0x298] sm:$0xff] %v577_v19  ;;  %v579_v20 = vld [vmem:[%s2888_s25 + $0x540] sm:$0xff]  ;;  %v581_v21 = vld [vmem:[%s2888_s25 + $0x550] sm:$0xff] }
  0x40   : > { %v583_v22 = vld [vmem:[%s2888_s25 + $0x560] sm:$0xff]  ;;  %580 = vst [vmem:[%s2893_s26 + $0x2a0] sm:$0xff] %v579_v20  ;;  %582 = vst [vmem:[%s2893_s26 + $0x2a8] sm:$0xff] %v581_v21  ;;  %v585_v23 = vld [vmem:[%s2888_s25 + $0x570] sm:$0xff] }
  0x41   : > { %584 = vst [vmem:[%s2893_s26 + $0x2b0] sm:$0xff] %v583_v22  ;;  %v587_v24 = vld [vmem:[%s2888_s25 + $0x580] sm:$0xff]  ;;  %v589_v25 = vld [vmem:[%s2888_s25 + $0x590] sm:$0xff]  ;;  %586 = vst [vmem:[%s2893_s26 + $0x2b8] sm:$0xff] %v585_v23 }
  0x42   : > { %588 = vst [vmem:[%s2893_s26 + $0x2c0] sm:$0xff] %v587_v24  ;;  %590 = vst [vmem:[%s2893_s26 + $0x2c8] sm:$0xff] %v589_v25  ;;  %v591_v26 = vld [vmem:[%s2888_s25 + $0x5a0] sm:$0xff]  ;;  %v593_v27 = vld [vmem:[%s2888_s25 + $0x5b0] sm:$0xff] }
  0x43   : > { %v595_v28 = vld [vmem:[%s2888_s25 + $0x5c0] sm:$0xff]  ;;  %592 = vst [vmem:[%s2893_s26 + $0x2d0] sm:$0xff] %v591_v26  ;;  %594 = vst [vmem:[%s2893_s26 + $0x2d8] sm:$0xff] %v593_v27  ;;  %v597_v29 = vld [vmem:[%s2888_s25 + $0x5d0] sm:$0xff] }
  0x44   : > { %596 = vst [vmem:[%s2893_s26 + $0x2e0] sm:$0xff] %v595_v28  ;;  %v599_v30 = vld [vmem:[%s2888_s25 + $0x5e0] sm:$0xff]  ;;  %v601_v31 = vld [vmem:[%s2888_s25 + $0x5f0] sm:$0xff]  ;;  %598 = vst [vmem:[%s2893_s26 + $0x2e8] sm:$0xff] %v597_v29 }
  0x45   : > { %600 = vst [vmem:[%s2893_s26 + $0x2f0] sm:$0xff] %v599_v30  ;;  %602 = vst [vmem:[%s2893_s26 + $0x2f8] sm:$0xff] %v601_v31  ;;  %v603_v32 = vld [vmem:[%s2888_s25 + $0x600] sm:$0xff]  ;;  %v605_v33 = vld [vmem:[%s2888_s25 + $0x610] sm:$0xff] }
  0x46   : > { %v607_v34 = vld [vmem:[%s2888_s25 + $0x620] sm:$0xff]  ;;  %604 = vst [vmem:[%s2893_s26 + $0x300] sm:$0xff] %v603_v32  ;;  %606 = vst [vmem:[%s2893_s26 + $0x308] sm:$0xff] %v605_v33  ;;  %v609_v35 = vld [vmem:[%s2888_s25 + $0x630] sm:$0xff] }
  0x47   : > { %608 = vst [vmem:[%s2893_s26 + $0x310] sm:$0xff] %v607_v34  ;;  %v611_v36 = vld [vmem:[%s2888_s25 + $0x640] sm:$0xff]  ;;  %v613_v37 = vld [vmem:[%s2888_s25 + $0x650] sm:$0xff]  ;;  %610 = vst [vmem:[%s2893_s26 + $0x318] sm:$0xff] %v609_v35 }
  0x48   : > { %612 = vst [vmem:[%s2893_s26 + $0x320] sm:$0xff] %v611_v36  ;;  %614 = vst [vmem:[%s2893_s26 + $0x328] sm:$0xff] %v613_v37  ;;  %v615_v38 = vld [vmem:[%s2888_s25 + $0x660] sm:$0xff]  ;;  %v617_v39 = vld [vmem:[%s2888_s25 + $0x670] sm:$0xff] }
  0x49   : > { %v619_v40 = vld [vmem:[%s2888_s25 + $0x680] sm:$0xff]  ;;  %616 = vst [vmem:[%s2893_s26 + $0x330] sm:$0xff] %v615_v38  ;;  %618 = vst [vmem:[%s2893_s26 + $0x338] sm:$0xff] %v617_v39  ;;  %v621_v41 = vld [vmem:[%s2888_s25 + $0x690] sm:$0xff] }
  0x4a   : > { %620 = vst [vmem:[%s2893_s26 + $0x340] sm:$0xff] %v619_v40  ;;  %v623_v42 = vld [vmem:[%s2888_s25 + $0x6a0] sm:$0xff]  ;;  %v625_v43 = vld [vmem:[%s2888_s25 + $0x6b0] sm:$0xff]  ;;  %622 = vst [vmem:[%s2893_s26 + $0x348] sm:$0xff] %v621_v41 }
  0x4b   : > { %624 = vst [vmem:[%s2893_s26 + $0x350] sm:$0xff] %v623_v42  ;;  %626 = vst [vmem:[%s2893_s26 + $0x358] sm:$0xff] %v625_v43  ;;  %v627_v44 = vld [vmem:[%s2888_s25 + $0x6c0] sm:$0xff]  ;;  %v629_v45 = vld [vmem:[%s2888_s25 + $0x6d0] sm:$0xff] }
  0x4c   : > { %v631_v46 = vld [vmem:[%s2888_s25 + $0x6e0] sm:$0xff]  ;;  %628 = vst [vmem:[%s2893_s26 + $0x360] sm:$0xff] %v627_v44  ;;  %630 = vst [vmem:[%s2893_s26 + $0x368] sm:$0xff] %v629_v45  ;;  %v633_v47 = vld [vmem:[%s2888_s25 + $0x6f0] sm:$0xff] }
  0x4d   : > { %632 = vst [vmem:[%s2893_s26 + $0x370] sm:$0xff] %v631_v46  ;;  %v635_v48 = vld [vmem:[%s2888_s25 + $0x700] sm:$0xff]  ;;  %v637_v49 = vld [vmem:[%s2888_s25 + $0x710] sm:$0xff]  ;;  %634 = vst [vmem:[%s2893_s26 + $0x378] sm:$0xff] %v633_v47 }
  0x4e   : > { %636 = vst [vmem:[%s2893_s26 + $0x380] sm:$0xff] %v635_v48  ;;  %638 = vst [vmem:[%s2893_s26 + $0x388] sm:$0xff] %v637_v49  ;;  %v639_v50 = vld [vmem:[%s2888_s25 + $0x720] sm:$0xff]  ;;  %v641_v51 = vld [vmem:[%s2888_s25 + $0x730] sm:$0xff] }
  0x4f   : > { %v643_v52 = vld [vmem:[%s2888_s25 + $0x740] sm:$0xff]  ;;  %640 = vst [vmem:[%s2893_s26 + $0x390] sm:$0xff] %v639_v50  ;;  %642 = vst [vmem:[%s2893_s26 + $0x398] sm:$0xff] %v641_v51  ;;  %v645_v53 = vld [vmem:[%s2888_s25 + $0x750] sm:$0xff] }
  0x50   : > { %644 = vst [vmem:[%s2893_s26 + $0x3a0] sm:$0xff] %v643_v52  ;;  %v647_v54 = vld [vmem:[%s2888_s25 + $0x760] sm:$0xff]  ;;  %v649_v55 = vld [vmem:[%s2888_s25 + $0x770] sm:$0xff]  ;;  %646 = vst [vmem:[%s2893_s26 + $0x3a8] sm:$0xff] %v645_v53 }
  0x51   : > { %648 = vst [vmem:[%s2893_s26 + $0x3b0] sm:$0xff] %v647_v54  ;;  %650 = vst [vmem:[%s2893_s26 + $0x3b8] sm:$0xff] %v649_v55  ;;  %v651_v56 = vld [vmem:[%s2888_s25 + $0x780] sm:$0xff]  ;;  %v653_v57 = vld [vmem:[%s2888_s25 + $0x790] sm:$0xff] }
  0x52   : > { %v655_v58 = vld [vmem:[%s2888_s25 + $0x7a0] sm:$0xff]  ;;  %652 = vst [vmem:[%s2893_s26 + $0x3c0] sm:$0xff] %v651_v56  ;;  %654 = vst [vmem:[%s2893_s26 + $0x3c8] sm:$0xff] %v653_v57  ;;  %v657_v59 = vld [vmem:[%s2888_s25 + $0x7b0] sm:$0xff] }
  0x53   : > { %656 = vst [vmem:[%s2893_s26 + $0x3d0] sm:$0xff] %v655_v58  ;;  %v659_v60 = vld [vmem:[%s2888_s25 + $0x7c0] sm:$0xff]  ;;  %v661_v61 = vld [vmem:[%s2888_s25 + $0x7d0] sm:$0xff]  ;;  %658 = vst [vmem:[%s2893_s26 + $0x3d8] sm:$0xff] %v657_v59 }
  0x54   : > { %660 = vst [vmem:[%s2893_s26 + $0x3e0] sm:$0xff] %v659_v60  ;;  %662 = vst [vmem:[%s2893_s26 + $0x3e8] sm:$0xff] %v661_v61  ;;  %v663_v62 = vld [vmem:[%s2888_s25 + $0x7e0] sm:$0xff]  ;;  %v665_v63 = vld [vmem:[%s2888_s25 + $0x7f0] sm:$0xff] }
  0x55   : > { %664 = vst [vmem:[%s2893_s26 + $0x3f0] sm:$0xff] %v663_v62  ;;  %666 = vst [vmem:[%s2893_s26 + $0x3f8] sm:$0xff] %v665_v63 }
  0x56 PF: > { %p2384_p8 = scmp.ge.s32.totalorder %s2822_s13, 1  ;;  %p671_p9 = scmp.lt.s32.totalorder %s2822_s13, 3 }
  0x58   : > { %p672_p10 = pnand %p2384_p8, %p671_p9 }
  0x59   : > { %s678_s27 = sand.u32 (!%p672_p10), 1, %s2806_s9   ;;  %v955_v0 = vld [vmem:[%s4239_s1 + $0x8] sm:$0xff] (!%p672_p10)  ;;  %v2824_v2 = vmov (!%p672_p10), 0.0|0.0  }
  0x5a   : > { %675 = sbr.rel (%p672_p10) target bundleno = 636 (0x27c), region = 62  ;;  %v959_v1 = vld [vmem:[%s4239_s1 + $0x28] sm:$0xff] (!%p672_p10)  ;;  %2391 = vmatprep.subr.bf16.mxu1 (!%p672_p10), %v2824_v2  ;;  %2487 = vmatprep.subr.bf16.mxu0 (!%p672_p10), %v2824_v2  ;;  %s2385_s4 = sshll.u32 (!%p672_p10), %s678_s27, 10 }
  0x5b   : > { %1274 = vmatprep.mubr.f32.mxu1 (!%p672_p10), %v955_v0  ;;  %1724 = vmatprep.mubr.f32.mxu0 (!%p672_p10), %v959_v1  ;;  %s3161_s5 = scalar_lea.vmem (!%p672_p10), [#allocation2], %s2385_s4  ;;  %s2386_s7 = sshll.u32 (!%p672_p10), %s678_s27, 8 }
  0x5c   : > { %v698_v3 = vld [vmem:[%s3161_s5] sm:$0xff] (!%p672_p10)  ;;  %v699_v4 = vld [vmem:[%s3161_s5 + $0x8] sm:$0xff] (!%p672_p10)  ;;  %v700_v10 = vld [vmem:[%s3161_s5 + $0x10] sm:$0xff] (!%p672_p10)  ;;  %s4117_s8 = scalar_lea.vmem (!%p672_p10), [#allocation3], %s2386_s7 }
  0x5d   : > { %v762_v5 = vld [vmem:[%s3161_s5 + $0x200] sm:$0xff] (!%p672_p10)  ;;  %v826_v6 = vmax.f32 (!%p672_p10), %v698_v3, 0.0  ;;  %v827_v7 = vmax.f32 (!%p672_p10), %v699_v4, 0.0  ;;  %v763_v8 = vld [vmem:[%s3161_s5 + $0x208] sm:$0xff] (!%p672_p10)  ;;  %v701_v11 = vld [vmem:[%s3161_s5 + $0x18] sm:$0xff] (!%p672_p10)  ;;  %v828_v13 = vmax.f32 (!%p672_p10), %v700_v10, 0.0 }
  0x5e   : > { %v890_v9 = vmax.f32 (!%p672_p10), %v762_v5, 0.0  ;;  %v891_v12 = vmax.f32 (!%p672_p10), %v763_v8, 0.0  ;;  %v829_v14 = vmax.f32 (!%p672_p10), %v701_v11, 0.0  ;;  %v764_v15 = vld [vmem:[%s3161_s5 + $0x210] sm:$0xff] (!%p672_p10)  ;;  %v765_v16 = vld [vmem:[%s3161_s5 + $0x218] sm:$0xff] (!%p672_p10)  ;;  %v702_v17 = vld [vmem:[%s3161_s5 + $0x20] sm:$0xff] (!%p672_p10) }
  0x5f   : > { %v2392_v18 = vpack.c.bf16 (!%p672_p10), %v827_v7, %v826_v6  ;;  %v892_v19 = vmax.f32 (!%p672_p10), %v764_v15, 0.0  ;;  %v893_v20 = vmax.f32 (!%p672_p10), %v765_v16, 0.0  ;;  %v703_v21 = vld [vmem:[%s3161_s5 + $0x28] sm:$0xff] (!%p672_p10)  ;;  %v766_v22 = vld [vmem:[%s3161_s5 + $0x220] sm:$0xff] (!%p672_p10)  ;;  %v830_v26 = vmax.f32 (!%p672_p10), %v702_v17, 0.0  ;;  %v704_v31 = vld [vmem:[%s3161_s5 + $0x30] sm:$0xff] (!%p672_p10) }
  0x60   : > { %v767_v23 = vld [vmem:[%s3161_s5 + $0x228] sm:$0xff] (!%p672_p10)  ;;  %v2488_v24 = vpack.c.bf16 (!%p672_p10), %v891_v12, %v890_v9  ;;  %v2395_v25 = vpack.c.bf16 (!%p672_p10), %v829_v14, %v828_v13  ;;  %v831_v27 = vmax.f32 (!%p672_p10), %v703_v21, 0.0  ;;  %v894_v29 = vmax.f32 (!%p672_p10), %v766_v22, 0.0  ;;  %v705_v32 = vld [vmem:[%s3161_s5 + $0x38] sm:$0xff] (!%p672_p10)  ;;  %v768_v33 = vld [vmem:[%s3161_s5 + $0x230] sm:$0xff] (!%p672_p10) }
  0x61   : > { %2393 = vmatpush1.bf16.msra.mxu1 %v2392_v18  ;;  %v2491_v28 = vpack.c.bf16 %v893_v20, %v892_v19  ;;  %v895_v30 = vmax.f32 %v767_v23, 0.0  ;;  %v769_v34 = vld [vmem:[%s3161_s5 + $0x238] sm:$0xff]  ;;  %v832_v36 = vmax.f32 %v704_v31, 0.0  ;;  %v833_v37 = vmax.f32 %v705_v32, 0.0  ;;  %v706_v41 = vld [vmem:[%s3161_s5 + $0x40] sm:$0xff]  ;;  %v707_v42 = vld [vmem:[%s3161_s5 + $0x48] sm:$0xff] }
  0x62   : > { %2489 = vmatpush1.bf16.msra.mxu0 %v2488_v24  ;;  %2394 = vmatprep.subr.bf16.mxu1 %v2824_v2  ;;  %v2398_v35 = vpack.c.bf16 %v831_v27, %v830_v26  ;;  %v896_v39 = vmax.f32 %v768_v33, 0.0  ;;  %v897_v40 = vmax.f32 %v769_v34, 0.0  ;;  %v770_v43 = vld [vmem:[%s3161_s5 + $0x240] sm:$0xff]  ;;  %v771_v44 = vld [vmem:[%s3161_s5 + $0x248] sm:$0xff]  ;;  %v834_v46 = vmax.f32 %v706_v41, 0.0  ;;  %v708_v51 = vld [vmem:[%s3161_s5 + $0x50] sm:$0xff] }
  0x63   : > { %2490 = vmatprep.subr.bf16.mxu0 %v2824_v2  ;;  %v2494_v38 = vpack.c.bf16 %v895_v30, %v894_v29  ;;  %v2401_v45 = vpack.c.bf16 %v833_v37, %v832_v36  ;;  %v835_v47 = vmax.f32 %v707_v42, 0.0  ;;  %v898_v49 = vmax.f32 %v770_v43, 0.0  ;;  %v709_v52 = vld [vmem:[%s3161_s5 + $0x58] sm:$0xff]  ;;  %v772_v53 = vld [vmem:[%s3161_s5 + $0x250] sm:$0xff]  ;;  %v710_v61 = vld [vmem:[%s3161_s5 + $0x60] sm:$0xff]  ;;  %s2388_s9 = sshll.u32 (%p2875_p6), %s2814_s11, 3 }
  0x64   : > { %v2497_v48 = vpack.c.bf16 %v897_v40, %v896_v39  ;;  %v899_v50 = vmax.f32 %v771_v44, 0.0  ;;  %v773_v54 = vld [vmem:[%s3161_s5 + $0x258] sm:$0xff]  ;;  %v836_v56 = vmax.f32 %v708_v51, 0.0  ;;  %v837_v57 = vmax.f32 %v709_v52, 0.0  ;;  %v711_v62 = vld [vmem:[%s3161_s5 + $0x68] sm:$0xff]  ;;  %v774_v63 = vld [vmem:[%s3161_s5 + $0x260] sm:$0xff]  ;;  %s4160_s16 = scalar_lea.vmem (%p2875_p6), %s4240_s2, %s2388_s9 }
  0x65   : > { %2396 = vmatpush1.bf16.msra.mxu1 %v2395_v25  ;;  %v2404_v55 = vpack.c.bf16 %v835_v47, %v834_v46  ;;  %v900_v59 = vmax.f32 %v772_v53, 0.0  ;;  %v901_v60 = vmax.f32 %v773_v54, 0.0  ;;  %v775_v0 = vld [vmem:[%s3161_s5 + $0x268] sm:$0xff]  ;;  %v838_v3 = vmax.f32 %v710_v61, 0.0  ;;  %v712_v8 = vld [vmem:[%s3161_s5 + $0x70] sm:$0xff]  ;;  %v713_v9 = vld [vmem:[%s3161_s5 + $0x78] sm:$0xff] }
  0x66   : > { %2492 = vmatpush1.bf16.msra.mxu0 %v2491_v28  ;;  %2397 = vmatprep.subr.bf16.mxu1 %v2824_v2  ;;  %v2500_v58 = vpack.c.bf16 %v899_v50, %v898_v49  ;;  %v2407_v1 = vpack.c.bf16 %v837_v57, %v836_v56  ;;  %v839_v4 = vmax.f32 %v711_v62, 0.0  ;;  %v902_v6 = vmax.f32 %v774_v63, 0.0  ;;  %v776_v10 = vld [vmem:[%s3161_s5 + $0x270] sm:$0xff]  ;;  %v777_v11 = vld [vmem:[%s3161_s5 + $0x278] sm:$0xff]  ;;  %v714_v18 = vld [vmem:[%s3161_s5 + $0x80] sm:$0xff] }
  0x67   : > { %2493 = vmatprep.subr.bf16.mxu0 %v2824_v2  ;;  %v2503_v5 = vpack.c.bf16 %v901_v60, %v900_v59  ;;  %v903_v7 = vmax.f32 %v775_v0, 0.0  ;;  %v840_v13 = vmax.f32 %v712_v8, 0.0  ;;  %v841_v14 = vmax.f32 %v713_v9, 0.0  ;;  %v715_v19 = vld [vmem:[%s3161_s5 + $0x88] sm:$0xff]  ;;  %v778_v20 = vld [vmem:[%s3161_s5 + $0x280] sm:$0xff]  ;;  %v716_v28 = vld [vmem:[%s3161_s5 + $0x90] sm:$0xff] }
  0x68   : > { %v2410_v12 = vpack.c.bf16 %v839_v4, %v838_v3  ;;  %v904_v16 = vmax.f32 %v776_v10, 0.0  ;;  %v905_v17 = vmax.f32 %v777_v11, 0.0  ;;  %v779_v21 = vld [vmem:[%s3161_s5 + $0x288] sm:$0xff]  ;;  %v842_v23 = vmax.f32 %v714_v18, 0.0  ;;  %v717_v29 = vld [vmem:[%s3161_s5 + $0x98] sm:$0xff]  ;;  %v780_v30 = vld [vmem:[%s3161_s5 + $0x290] sm:$0xff] }
  0x69   : > { %2399 = vmatpush1.bf16.msra.mxu1 %v2398_v35  ;;  %v2506_v15 = vpack.c.bf16 %v903_v7, %v902_v6  ;;  %v2413_v22 = vpack.c.bf16 %v841_v14, %v840_v13  ;;  %v843_v24 = vmax.f32 %v715_v19, 0.0  ;;  %v906_v26 = vmax.f32 %v778_v20, 0.0  ;;  %v781_v31 = vld [vmem:[%s3161_s5 + $0x298] sm:$0xff]  ;;  %v719_v39 = vld [vmem:[%s3161_s5 + $0xa8] sm:$0xff]  ;;  %v782_v40 = vld [vmem:[%s3161_s5 + $0x2a0] sm:$0xff] }
  0x6a   : > { %2495 = vmatpush1.bf16.msra.mxu0 %v2494_v38  ;;  %2400 = vmatprep.subr.bf16.mxu1 %v2824_v2  ;;  %v2509_v25 = vpack.c.bf16 %v905_v17, %v904_v16  ;;  %v907_v27 = vmax.f32 %v779_v21, 0.0  ;;  %v844_v33 = vmax.f32 %v716_v28, 0.0  ;;  %v845_v34 = vmax.f32 %v717_v29, 0.0  ;;  %v718_v38 = vld [vmem:[%s3161_s5 + $0xa0] sm:$0xff]  ;;  %v783_v41 = vld [vmem:[%s3161_s5 + $0x2a8] sm:$0xff]  ;;  %v721_v49 = vld [vmem:[%s3161_s5 + $0xb8] sm:$0xff] }
  0x6b   : > { %2496 = vmatprep.subr.bf16.mxu0 %v2824_v2  ;;  %v2416_v32 = vpack.c.bf16 %v843_v24, %v842_v23  ;;  %v908_v36 = vmax.f32 %v780_v30, 0.0  ;;  %v909_v37 = vmax.f32 %v781_v31, 0.0  ;;  %v846_v43 = vmax.f32 %v718_v38, 0.0  ;;  %v784_v50 = vld [vmem:[%s3161_s5 + $0x2b0] sm:$0xff]  ;;  %v785_v51 = vld [vmem:[%s3161_s5 + $0x2b8] sm:$0xff]  ;;  %v723_v59 = vld [vmem:[%s3161_s5 + $0xc8] sm:$0xff] }
  0x6c   : > { %v2512_v35 = vpack.c.bf16 %v907_v27, %v906_v26  ;;  %v2419_v42 = vpack.c.bf16 %v845_v34, %v844_v33  ;;  %v847_v44 = vmax.f32 %v719_v39, 0.0  ;;  %v910_v46 = vmax.f32 %v782_v40, 0.0  ;;  %v786_v60 = vld [vmem:[%s3161_s5 + $0x2c0] sm:$0xff]  ;;  %v787_v61 = vld [vmem:[%s3161_s5 + $0x2c8] sm:$0xff]  ;;  %v725_v6 = vld [vmem:[%s3161_s5 + $0xd8] sm:$0xff] }
  0x6d   : > { %2402 = vmatpush1.bf16.msra.mxu1 %v2401_v45  ;;  %v2515_v45 = vpack.c.bf16 %v909_v37, %v908_v36  ;;  %v911_v47 = vmax.f32 %v783_v41, 0.0  ;;  %v849_v54 = vmax.f32 %v721_v49, 0.0  ;;  %v912_v56 = vmax.f32 %v784_v50, 0.0  ;;  %v788_v7 = vld [vmem:[%s3161_s5 + $0x2d0] sm:$0xff]  ;;  %v789_v8 = vld [vmem:[%s3161_s5 + $0x2d8] sm:$0xff]  ;;  %v727_v16 = vld [vmem:[%s3161_s5 + $0xe8] sm:$0xff] }
  0x6e   : > { %2498 = vmatpush1.bf16.msra.mxu0 %v2497_v48  ;;  %2403 = vmatprep.subr.bf16.mxu1 %v2824_v2  ;;  %v720_v48 = vld [vmem:[%s3161_s5 + $0xb0] sm:$0xff]  ;;  %v2422_v52 = vpack.c.bf16 %v847_v44, %v846_v43  ;;  %v913_v57 = vmax.f32 %v785_v51, 0.0  ;;  %v851_v0 = vmax.f32 %v723_v59, 0.0  ;;  %v914_v3 = vmax.f32 %v786_v60, 0.0  ;;  %v790_v17 = vld [vmem:[%s3161_s5 + $0x2e0] sm:$0xff]  ;;  %v791_v18 = vld [vmem:[%s3161_s5 + $0x2e8] sm:$0xff] }
  0x6f   : > { %2499 = vmatprep.subr.bf16.mxu0 %v2824_v2  ;;  %v848_v53 = vmax.f32 %v720_v48, 0.0  ;;  %v915_v4 = vmax.f32 %v787_v61, 0.0  ;;  %v853_v11 = vmax.f32 %v725_v6, 0.0  ;;  %v916_v13 = vmax.f32 %v788_v7, 0.0  ;;  %v729_v26 = vld [vmem:[%s3161_s5 + $0xf8] sm:$0xff]  ;;  %v792_v27 = vld [vmem:[%s3161_s5 + $0x2f0] sm:$0xff] }
  0x70   : > { %v917_v14 = vmax.f32 %v789_v8, 0.0  ;;  %v855_v21 = vmax.f32 %v727_v16, 0.0  ;;  %v918_v23 = vmax.f32 %v790_v17, 0.0  ;;  %v919_v24 = vmax.f32 %v791_v18, 0.0  ;;  %v793_v28 = vld [vmem:[%s3161_s5 + $0x2f8] sm:$0xff]  ;;  %v731_v36 = vld [vmem:[%s3161_s5 + $0x108] sm:$0xff] }
  0x71   : > { %2405 = vmatpush1.bf16.msra.mxu1 %v2404_v55  ;;  %v2518_v55 = vpack.c.bf16 %v911_v47, %v910_v46  ;;  %v2425_v62 = vpack.c.bf16 %v849_v54, %v848_v53  ;;  %v857_v31 = vmax.f32 %v729_v26, 0.0  ;;  %v920_v33 = vmax.f32 %v792_v27, 0.0  ;;  %v794_v37 = vld [vmem:[%s3161_s5 + $0x300] sm:$0xff]  ;;  %v795_v38 = vld [vmem:[%s3161_s5 + $0x308] sm:$0xff]  ;;  %v733_v46 = vld [vmem:[%s3161_s5 + $0x118] sm:$0xff] }
  0x72   : > { %2501 = vmatpush1.bf16.msra.mxu0 %v2500_v58  ;;  %2406 = vmatprep.subr.bf16.mxu1 %v2824_v2  ;;  %v722_v58 = vld [vmem:[%s3161_s5 + $0xc0] sm:$0xff]  ;;  %v921_v34 = vmax.f32 %v793_v28, 0.0  ;;  %v859_v41 = vmax.f32 %v731_v36, 0.0  ;;  %v922_v43 = vmax.f32 %v794_v37, 0.0  ;;  %v923_v44 = vmax.f32 %v795_v38, 0.0  ;;  %v796_v47 = vld [vmem:[%s3161_s5 + $0x310] sm:$0xff] }
  0x73   : > { %2502 = vmatprep.subr.bf16.mxu0 %v2824_v2  ;;  %v850_v63 = vmax.f32 %v722_v58, 0.0  ;;  %v797_v48 = vld [vmem:[%s3161_s5 + $0x318] sm:$0xff]  ;;  %v954_v49 = vld [vmem:[%s4239_s1] sm:$0xff]  ;;  %v861_v54 = vmax.f32 %v733_v46, 0.0  ;;  %v735_v59 = vld [vmem:[%s3161_s5 + $0x128] sm:$0xff] }
  0x74   : > { %v958_v51 = vld [vmem:[%s4239_s1 + $0x20] sm:$0xff]  ;;  %v967_v60 = vld [vmem:[%s4239_s1 + $0x68] sm:$0xff]  ;;  %v740_v38 = vld [vmem:[%s3161_s5 + $0x150] sm:$0xff] }
  0x75   : > { %2408 = vmatpush1.bf16.msra.mxu1 %v2407_v1  ;;  %v2521_v1 = vpack.c.bf16 %v913_v57, %v912_v56  ;;  %v2428_v9 = vpack.c.bf16 %v851_v0, %v850_v63  ;;  %v924_v56 = vmax.f32 %v796_v47, 0.0  ;;  %v925_v57 = vmax.f32 %v797_v48, 0.0  ;;  %v734_v58 = vld [vmem:[%s3161_s5 + $0x120] sm:$0xff]  ;;  %v975_v6 = vld [vmem:[%s4239_s1 + $0xa8] sm:$0xff] }
  0x76   : > { %2504 = vmatpush1.bf16.msra.mxu0 %v2503_v5  ;;  %2409 = vmatprep.subr.bf16.mxu1 %v2824_v2  ;;  %v724_v5 = vld [vmem:[%s3161_s5 + $0xd0] sm:$0xff]  ;;  %v798_v61 = vld [vmem:[%s3161_s5 + $0x320] sm:$0xff]  ;;  %v979_v16 = vld [vmem:[%s4239_s1 + $0xc8] sm:$0xff]  ;;  %v868_v46 = vmax.f32 %v740_v38, 0.0 }
  0x77   : > { %2505 = vmatprep.subr.bf16.mxu0 %v2824_v2  ;;  %v852_v10 = vmax.f32 %v724_v5, 0.0  ;;  %v962_v63 = vld [vmem:[%s4239_s1 + $0x40] sm:$0xff]  ;;  %v863_v5 = vmax.f32 %v735_v59, 0.0  ;;  %v2539_v7 = vpack.c.bf16 %v925_v57, %v924_v56  ;;  %v926_v8 = vmax.f32 %v798_v61, 0.0  ;;  %v803_v27 = vld [vmem:[%s3161_s5 + $0x348] sm:$0xff] }
  0x78   : > { %v966_v0 = vld [vmem:[%s4239_s1 + $0x60] sm:$0xff]  ;;  %v931_v37 = vmax.f32 %v803_v27, 0.0  ;;  %v999_v48 = vld [vmem:[%s4239_s1 + $0x168] sm:$0xff] }
  0x79   : > { %2411 = vmatpush1.bf16.msra.mxu1 %v2410_v12  ;;  %v2524_v12 = vpack.c.bf16 %v915_v4, %v914_v3  ;;  %v2431_v19 = vpack.c.bf16 %v853_v11, %v852_v10  ;;  %v862_v4 = vmax.f32 %v734_v58, 0.0  ;;  %v736_v10 = vld [vmem:[%s3161_s5 + $0x130] sm:$0xff]  ;;  %v737_v11 = vld [vmem:[%s3161_s5 + $0x138] sm:$0xff]  ;;  %v802_v26 = vld [vmem:[%s3161_s5 + $0x340] sm:$0xff] }
  0x7a   : > { %2507 = vmatpush1.bf16.msra.mxu0 %v2506_v15  ;;  %2412 = vmatprep.subr.bf16.mxu1 %v2824_v2  ;;  %v726_v15 = vld [vmem:[%s3161_s5 + $0xe0] sm:$0xff]  ;;  %v864_v18 = vmax.f32 %v736_v10, 0.0  ;;  %v930_v36 = vmax.f32 %v802_v26, 0.0  ;;  %v1003_v58 = vld [vmem:[%s4239_s1 + $0x188] sm:$0xff] }
  0x7b   : > { %2508 = vmatprep.subr.bf16.mxu0 %v2824_v2  ;;  %v854_v20 = vmax.f32 %v726_v15, 0.0  ;;  %v974_v15 = vld [vmem:[%s4239_s1 + $0xa0] sm:$0xff]  ;;  %v2446_v17 = vpack.c.bf16 %v863_v5, %v862_v4  ;;  %v745_v4 = vld [vmem:[%s3161_s5 + $0x178] sm:$0xff]  ;;  %v808_v5 = vld [vmem:[%s3161_s5 + $0x370] sm:$0xff] }
  0x7c   : > { %v978_v28 = vld [vmem:[%s4239_s1 + $0xc0] sm:$0xff]  ;;  %v1023_v27 = vld [vmem:[%s4239_s1 + $0x228] sm:$0xff] }
  0x7d   : > { %2414 = vmatpush1.bf16.msra.mxu1 %v2413_v22  ;;  %v2527_v22 = vpack.c.bf16 %v917_v14, %v916_v13  ;;  %v2434_v29 = vpack.c.bf16 %v855_v21, %v854_v20  ;;  %v801_v13 = vld [vmem:[%s3161_s5 + $0x338] sm:$0xff]  ;;  %v970_v14 = vld [vmem:[%s4239_s1 + $0x80] sm:$0xff]  ;;  %v983_v20 = vld [vmem:[%s4239_s1 + $0xe8] sm:$0xff] }
  0x7e   : > { %2510 = vmatpush1.bf16.msra.mxu0 %v2509_v25  ;;  %2415 = vmatprep.subr.bf16.mxu1 %v2824_v2  ;;  %v728_v25 = vld [vmem:[%s3161_s5 + $0xf0] sm:$0xff]  ;;  %v994_v56 = vld [vmem:[%s4239_s1 + $0x140] sm:$0xff] }
  0x7f   : > { %2511 = vmatprep.subr.bf16.mxu0 %v2824_v2  ;;  %v856_v30 = vmax.f32 %v728_v25, 0.0  ;;  %v739_v25 = vld [vmem:[%s3161_s5 + $0x148] sm:$0xff]  ;;  %v998_v57 = vld [vmem:[%s4239_s1 + $0x160] sm:$0xff] }
  0x81   : > { %2417 = vmatpush1.bf16.msra.mxu1 %v2416_v32  ;;  %v2530_v32 = vpack.c.bf16 %v919_v24, %v918_v23  ;;  %v2437_v39 = vpack.c.bf16 %v857_v31, %v856_v30  ;;  %v929_v23 = vmax.f32 %v801_v13, 0.0  ;;  %v738_v24 = vld [vmem:[%s3161_s5 + $0x140] sm:$0xff]  ;;  %v987_v30 = vld [vmem:[%s4239_s1 + $0x108] sm:$0xff] }
  0x82   : > { %2513 = vmatpush1.bf16.msra.mxu0 %v2512_v35  ;;  %2418 = vmatprep.subr.bf16.mxu1 %v2824_v2  ;;  %v730_v35 = vld [vmem:[%s3161_s5 + $0x100] sm:$0xff]  ;;  %v1015_v13 = vld [vmem:[%s4239_s1 + $0x1e8] sm:$0xff] }
  0x83   : > { %2514 = vmatprep.subr.bf16.mxu0 %v2824_v2  ;;  %v858_v40 = vmax.f32 %v730_v35, 0.0 }
  0x85   : > { %2420 = vmatpush1.bf16.msra.mxu1 %v2419_v42  ;;  %v2533_v42 = vpack.c.bf16 %v921_v34, %v920_v33  ;;  %v2440_v50 = vpack.c.bf16 %v859_v41, %v858_v40  ;;  %v867_v33 = vmax.f32 %v739_v25, 0.0  ;;  %v991_v34 = vld [vmem:[%s4239_s1 + $0x128] sm:$0xff]  ;;  %v804_v40 = vld [vmem:[%s3161_s5 + $0x350] sm:$0xff]  ;;  %v805_v41 = vld [vmem:[%s3161_s5 + $0x358] sm:$0xff] }
  0x86   : > { %2516 = vmatpush1.bf16.msra.mxu0 %v2515_v45  ;;  %2421 = vmatprep.subr.bf16.mxu1 %v2824_v2  ;;  %v732_v45 = vld [vmem:[%s3161_s5 + $0x110] sm:$0xff] }
  0x87   : > { %2517 = vmatprep.subr.bf16.mxu0 %v2824_v2  ;;  %v860_v53 = vmax.f32 %v732_v45, 0.0 }
  0x89   : > { %2423 = vmatpush1.bf16.msra.mxu1 %v2422_v52  ;;  %v2536_v52 = vpack.c.bf16 %v923_v44, %v922_v43  ;;  %v2443_v3 = vpack.c.bf16 %v861_v54, %v860_v53  ;;  %v990_v43 = vld [vmem:[%s4239_s1 + $0x120] sm:$0xff]  ;;  %v995_v44 = vld [vmem:[%s4239_s1 + $0x148] sm:$0xff] }
  0x8a   : > { %2519 = vmatpush1.bf16.msra.mxu0 %v2518_v55  ;;  %2424 = vmatprep.subr.bf16.mxu1 %v2824_v2  ;;  %v963_v55 = vld [vmem:[%s4239_s1 + $0x48] sm:$0xff]  ;;  %v806_v54 = vld [vmem:[%s3161_s5 + $0x360] sm:$0xff] }
  0x8b   : > { %2520 = vmatprep.subr.bf16.mxu0 %v2824_v2  ;;  %v743_v53 = vld [vmem:[%s3161_s5 + $0x168] sm:$0xff] }
  0x8c   : > { %v871_v61 = vmax.f32 %v743_v53, 0.0 }
  0x8d   : > { %2426 = vmatpush1.bf16.msra.mxu1 %v2425_v62  ;;  %v799_v62 = vld [vmem:[%s3161_s5 + $0x328] sm:$0xff] }
  0x8e   : > { %2522 = vmatpush1.bf16.msra.mxu0 %v2521_v1  ;;  %2427 = vmatprep.subr.bf16.mxu1 %v2824_v2  ;;  %v971_v1 = vld [vmem:[%s4239_s1 + $0x88] sm:$0xff] }
  0x8f   : > { %2523 = vmatprep.subr.bf16.mxu0 %v2824_v2 }
  0x91   : > { %2429 = vmatpush1.bf16.msra.mxu1 %v2428_v9  ;;  %v927_v9 = vmax.f32 %v799_v62, 0.0  ;;  %v1007_v62 = vld [vmem:[%s4239_s1 + $0x1a8] sm:$0xff] }
  0x92   : > { %2525 = vmatpush1.bf16.msra.mxu0 %v2524_v12  ;;  %2430 = vmatprep.subr.bf16.mxu1 %v2824_v2  ;;  %v800_v12 = vld [vmem:[%s3161_s5 + $0x330] sm:$0xff] }
  0x93   : > { %2526 = vmatprep.subr.bf16.mxu0 %v2824_v2  ;;  %v2542_v21 = vpack.c.bf16 %v927_v9, %v926_v8  ;;  %v1006_v8 = vld [vmem:[%s4239_s1 + $0x1a0] sm:$0xff]  ;;  %v1011_v9 = vld [vmem:[%s4239_s1 + $0x1c8] sm:$0xff] }
  0x95   : > { %2432 = vmatpush1.bf16.msra.mxu1 %v2431_v19  ;;  %v865_v19 = vmax.f32 %v737_v11, 0.0 }
  0x96   : > { %2528 = vmatpush1.bf16.msra.mxu0 %v2527_v22  ;;  %2433 = vmatprep.subr.bf16.mxu1 %v2824_v2  ;;  %v928_v22 = vmax.f32 %v800_v12, 0.0  ;;  %v873_v12 = vmax.f32 %v745_v4, 0.0 }
  0x97   : > { %2529 = vmatprep.subr.bf16.mxu0 %v2824_v2  ;;  %v2449_v31 = vpack.c.bf16 %v865_v19, %v864_v18  ;;  %v747_v18 = vld [vmem:[%s3161_s5 + $0x188] sm:$0xff]  ;;  %v810_v19 = vld [vmem:[%s3161_s5 + $0x380] sm:$0xff] }
  0x98   : > { %v2545_v35 = vpack.c.bf16 %v929_v23, %v928_v22  ;;  %v1014_v22 = vld [vmem:[%s4239_s1 + $0x1e0] sm:$0xff]  ;;  %v1019_v23 = vld [vmem:[%s4239_s1 + $0x208] sm:$0xff]  ;;  %v875_v26 = vmax.f32 %v747_v18, 0.0 }
  0x99   : > { %2435 = vmatpush1.bf16.msra.mxu1 %v2434_v29  ;;  %v982_v29 = vld [vmem:[%s4239_s1 + $0xe0] sm:$0xff] }
  0x9a   : > { %2531 = vmatpush1.bf16.msra.mxu0 %v2530_v32  ;;  %2436 = vmatprep.subr.bf16.mxu1 %v2824_v2  ;;  %v866_v32 = vmax.f32 %v738_v24, 0.0 }
  0x9b   : > { %2532 = vmatprep.subr.bf16.mxu0 %v2824_v2 }
  0x9c   : > { %v2452_v45 = vpack.c.bf16 %v867_v33, %v866_v32  ;;  %v749_v32 = vld [vmem:[%s3161_s5 + $0x198] sm:$0xff]  ;;  %v812_v33 = vld [vmem:[%s3161_s5 + $0x390] sm:$0xff] }
  0x9d   : > { %2438 = vmatpush1.bf16.msra.mxu1 %v2437_v39  ;;  %v741_v39 = vld [vmem:[%s3161_s5 + $0x158] sm:$0xff] }
  0x9e   : > { %2534 = vmatpush1.bf16.msra.mxu0 %v2533_v42  ;;  %2439 = vmatprep.subr.bf16.mxu1 %v2824_v2  ;;  %v986_v42 = vld [vmem:[%s4239_s1 + $0x100] sm:$0xff]  ;;  %v869_v47 = vmax.f32 %v741_v39, 0.0 }
  0x9f   : > { %2535 = vmatprep.subr.bf16.mxu0 %v2824_v2 }
  0xa0   : > { %1275 = vmatmul.mubr.f32.vlgmr.msra.gmra.mrb[0].mxu1 %v954_v49  ;;  %v2548_v49 = vpack.c.bf16 %v931_v37, %v930_v36  ;;  %v2455_v59 = vpack.c.bf16 %v869_v47, %v868_v46  ;;  %v1022_v36 = vld [vmem:[%s4239_s1 + $0x220] sm:$0xff]  ;;  %v1027_v37 = vld [vmem:[%s4239_s1 + $0x248] sm:$0xff] }
  0xa1   : > { %1725 = vmatmul.mubr.f32.vlgmr.msra.gmra.mrb[0].mxu0 %v958_v51  ;;  %2441 = vmatpush1.bf16.msra.mxu1 %v2440_v50  ;;  %v932_v50 = vmax.f32 %v804_v40, 0.0  ;;  %v933_v51 = vmax.f32 %v805_v41, 0.0  ;;  %v877_v40 = vmax.f32 %v749_v32, 0.0  ;;  %v1031_v41 = vld [vmem:[%s4239_s1 + $0x268] sm:$0xff]  ;;  %v814_v47 = vld [vmem:[%s3161_s5 + $0x3a0] sm:$0xff] }
  0xa2   : > { %2537 = vmatpush1.bf16.msra.mxu0 %v2536_v52  ;;  %1279 = vmatprep.mubr.f32.mxu1 %v963_v55  ;;  %v742_v52 = vld [vmem:[%s3161_s5 + $0x160] sm:$0xff]  ;;  %v807_v55 = vld [vmem:[%s3161_s5 + $0x368] sm:$0xff] }
  0xa3   : > { %1729 = vmatprep.mubr.f32.mxu0 %v967_v60  ;;  %2442 = vmatprep.subr.bf16.mxu1 %v2824_v2  ;;  %v870_v60 = vmax.f32 %v742_v52, 0.0  ;;  %v751_v46 = vld [vmem:[%s3161_s5 + $0x1a8] sm:$0xff] }
  0xa4   : > { %1280 = vmatmul.mubr.f32.gmra.mrb[2].mxu1 %v962_v63  ;;  %2538 = vmatprep.subr.bf16.mxu0 %v2824_v2  ;;  %v2551_v63 = vpack.c.bf16 %v933_v51, %v932_v50  ;;  %v1030_v50 = vld [vmem:[%s4239_s1 + $0x260] sm:$0xff]  ;;  %v1035_v51 = vld [vmem:[%s4239_s1 + $0x288] sm:$0xff] }
  0xa5   : > { %1730 = vmatmul.mubr.f32.gmra.mrb[2].mxu0 %v966_v0  ;;  %1284 = vmatprep.mubr.f32.mxu1 %v971_v1  ;;  %v934_v0 = vmax.f32 %v806_v54, 0.0  ;;  %v935_v1 = vmax.f32 %v807_v55, 0.0  ;;  %v2458_v10 = vpack.c.bf16 %v871_v61, %v870_v60  ;;  %v879_v54 = vmax.f32 %v751_v46, 0.0  ;;  %v1039_v55 = vld [vmem:[%s4239_s1 + $0x2a8] sm:$0xff]  ;;  %v753_v60 = vld [vmem:[%s3161_s5 + $0x1b8] sm:$0xff]  ;;  %v816_v61 = vld [vmem:[%s3161_s5 + $0x3b0] sm:$0xff] }
  0xa6   : > { %1734 = vmatprep.mubr.f32.mxu0 %v975_v6  ;;  %2444 = vmatpush1.bf16.msra.mxu1 %v2443_v3  ;;  %v744_v3 = vld [vmem:[%s3161_s5 + $0x170] sm:$0xff]  ;;  %v809_v6 = vld [vmem:[%s3161_s5 + $0x378] sm:$0xff] }
  0xa7   : > { %2540 = vmatpush1.bf16.msra.mxu0 %v2539_v7  ;;  %2445 = vmatprep.subr.bf16.mxu1 %v2824_v2  ;;  %v1002_v7 = vld [vmem:[%s4239_s1 + $0x180] sm:$0xff]  ;;  %v872_v11 = vmax.f32 %v744_v3, 0.0 }
  0xa8   : > { %1285 = vmatmul.mubr.f32.gmra.mrb[4].mxu1 %v970_v14  ;;  %2541 = vmatprep.subr.bf16.mxu0 %v2824_v2  ;;  %v2554_v14 = vpack.c.bf16 %v935_v1, %v934_v0  ;;  %v1038_v0 = vld [vmem:[%s4239_s1 + $0x2a0] sm:$0xff]  ;;  %v1043_v1 = vld [vmem:[%s4239_s1 + $0x2c8] sm:$0xff] }
  0xa9   : > { %1735 = vmatmul.mubr.f32.gmra.mrb[4].mxu0 %v974_v15  ;;  %1289 = vmatprep.mubr.f32.mxu1 %v979_v16  ;;  %v936_v15 = vmax.f32 %v808_v5, 0.0  ;;  %v937_v16 = vmax.f32 %v809_v6, 0.0  ;;  %v2461_v24 = vpack.c.bf16 %v873_v12, %v872_v11  ;;  %v881_v5 = vmax.f32 %v753_v60, 0.0  ;;  %v1047_v6 = vld [vmem:[%s4239_s1 + $0x2e8] sm:$0xff]  ;;  %v818_v12 = vld [vmem:[%s3161_s5 + $0x3c0] sm:$0xff] }
  0xaa   : > { %1739 = vmatprep.mubr.f32.mxu0 %v983_v20  ;;  %2447 = vmatpush1.bf16.msra.mxu1 %v2446_v17  ;;  %v746_v17 = vld [vmem:[%s3161_s5 + $0x180] sm:$0xff]  ;;  %v811_v20 = vld [vmem:[%s3161_s5 + $0x388] sm:$0xff] }
  0xab   : > { %2543 = vmatpush1.bf16.msra.mxu0 %v2542_v21  ;;  %2448 = vmatprep.subr.bf16.mxu1 %v2824_v2  ;;  %v1010_v21 = vld [vmem:[%s4239_s1 + $0x1c0] sm:$0xff]  ;;  %v874_v25 = vmax.f32 %v746_v17, 0.0  ;;  %v755_v11 = vld [vmem:[%s3161_s5 + $0x1c8] sm:$0xff] }
  0xac   : > { %1290 = vmatmul.mubr.f32.gmra.mrb[6].mxu1 %v978_v28  ;;  %2544 = vmatprep.subr.bf16.mxu0 %v2824_v2  ;;  %v2557_v28 = vpack.c.bf16 %v937_v16, %v936_v15  ;;  %v1046_v15 = vld [vmem:[%s4239_s1 + $0x2e0] sm:$0xff]  ;;  %v1051_v16 = vld [vmem:[%s4239_s1 + $0x308] sm:$0xff] }
  0xad   : > { %1740 = vmatmul.mubr.f32.gmra.mrb[6].mxu0 %v982_v29  ;;  %1294 = vmatprep.mubr.f32.mxu1 %v987_v30  ;;  %v938_v29 = vmax.f32 %v810_v19, 0.0  ;;  %v939_v30 = vmax.f32 %v811_v20, 0.0  ;;  %v2464_v38 = vpack.c.bf16 %v875_v26, %v874_v25  ;;  %v883_v19 = vmax.f32 %v755_v11, 0.0  ;;  %v1055_v20 = vld [vmem:[%s4239_s1 + $0x328] sm:$0xff]  ;;  %v757_v25 = vld [vmem:[%s3161_s5 + $0x1d8] sm:$0xff]  ;;  %v820_v26 = vld [vmem:[%s3161_s5 + $0x3d0] sm:$0xff] }
  0xae   : > { %1744 = vmatprep.mubr.f32.mxu0 %v991_v34  ;;  %2450 = vmatpush1.bf16.msra.mxu1 %v2449_v31  ;;  %v748_v31 = vld [vmem:[%s3161_s5 + $0x190] sm:$0xff]  ;;  %v813_v34 = vld [vmem:[%s3161_s5 + $0x398] sm:$0xff]  ;;  %v1091_v11 = vld [vmem:[%s4239_s1 + $0x448] sm:$0xff] }
  0xaf   : > { %2546 = vmatpush1.bf16.msra.mxu0 %v2545_v35  ;;  %2451 = vmatprep.subr.bf16.mxu1 %v2824_v2  ;;  %v1018_v35 = vld [vmem:[%s4239_s1 + $0x200] sm:$0xff]  ;;  %v876_v39 = vmax.f32 %v748_v31, 0.0 }
  0xb0   : > { %1295 = vmatmul.mubr.f32.gmra.mrb[8].mxu1 %v986_v42  ;;  %2547 = vmatprep.subr.bf16.mxu0 %v2824_v2  ;;  %v2560_v42 = vpack.c.bf16 %v939_v30, %v938_v29  ;;  %v1054_v29 = vld [vmem:[%s4239_s1 + $0x320] sm:$0xff]  ;;  %v1059_v30 = vld [vmem:[%s4239_s1 + $0x348] sm:$0xff] }
  0xb1   : > { %1745 = vmatmul.mubr.f32.gmra.mrb[8].mxu0 %v990_v43  ;;  %1299 = vmatprep.mubr.f32.mxu1 %v995_v44  ;;  %v940_v43 = vmax.f32 %v812_v33, 0.0  ;;  %v941_v44 = vmax.f32 %v813_v34, 0.0  ;;  %v2467_v52 = vpack.c.bf16 %v877_v40, %v876_v39  ;;  %v885_v33 = vmax.f32 %v757_v25, 0.0  ;;  %v1063_v34 = vld [vmem:[%s4239_s1 + $0x368] sm:$0xff]  ;;  %v822_v40 = vld [vmem:[%s3161_s5 + $0x3e0] sm:$0xff] }
  0xb2   : > { %1749 = vmatprep.mubr.f32.mxu0 %v999_v48  ;;  %2453 = vmatpush1.bf16.msra.mxu1 %v2452_v45  ;;  %v750_v45 = vld [vmem:[%s3161_s5 + $0x1a0] sm:$0xff]  ;;  %v815_v48 = vld [vmem:[%s3161_s5 + $0x3a8] sm:$0xff] }
  0xb3   : > { %2549 = vmatpush1.bf16.msra.mxu0 %v2548_v49  ;;  %2454 = vmatprep.subr.bf16.mxu1 %v2824_v2  ;;  %v1026_v49 = vld [vmem:[%s4239_s1 + $0x240] sm:$0xff]  ;;  %v878_v53 = vmax.f32 %v750_v45, 0.0  ;;  %v759_v39 = vld [vmem:[%s3161_s5 + $0x1e8] sm:$0xff] }
  0xb4   : > { %1300 = vmatmul.mubr.f32.gmra.mrb[10].mxu1 %v994_v56  ;;  %2550 = vmatprep.subr.bf16.mxu0 %v2824_v2  ;;  %v2563_v56 = vpack.c.bf16 %v941_v44, %v940_v43  ;;  %v1062_v43 = vld [vmem:[%s4239_s1 + $0x360] sm:$0xff]  ;;  %v1067_v44 = vld [vmem:[%s4239_s1 + $0x388] sm:$0xff] }
  0xb5   : > { %1750 = vmatmul.mubr.f32.gmra.mrb[10].mxu0 %v998_v57  ;;  %1304 = vmatprep.mubr.f32.mxu1 %v1003_v58  ;;  %v942_v57 = vmax.f32 %v814_v47, 0.0  ;;  %v943_v58 = vmax.f32 %v815_v48, 0.0  ;;  %v2470_v3 = vpack.c.bf16 %v879_v54, %v878_v53  ;;  %v887_v47 = vmax.f32 %v759_v39, 0.0  ;;  %v1071_v48 = vld [vmem:[%s4239_s1 + $0x3a8] sm:$0xff]  ;;  %v761_v53 = vld [vmem:[%s3161_s5 + $0x1f8] sm:$0xff]  ;;  %v824_v54 = vld [vmem:[%s3161_s5 + $0x3f0] sm:$0xff] }
  0xb6   : > { %1754 = vmatprep.mubr.f32.mxu0 %v1007_v62  ;;  %2456 = vmatpush1.bf16.msra.mxu1 %v2455_v59  ;;  %v752_v59 = vld [vmem:[%s3161_s5 + $0x1b0] sm:$0xff]  ;;  %v817_v62 = vld [vmem:[%s3161_s5 + $0x3b8] sm:$0xff]  ;;  %v1118_v25 = vld [vmem:[%s4239_s1 + $0x520] sm:$0xff] }
  0xb7   : > { %2552 = vmatpush1.bf16.msra.mxu0 %v2551_v63  ;;  %2457 = vmatprep.subr.bf16.mxu1 %v2824_v2  ;;  %v1034_v63 = vld [vmem:[%s4239_s1 + $0x280] sm:$0xff]  ;;  %v880_v4 = vmax.f32 %v752_v59, 0.0  ;;  %v1151_v39 = vld [vmem:[%s4239_s1 + $0x628] sm:$0xff] }
  0xb8   : > { %1305 = vmatmul.mubr.f32.gmra.mrb[12].mxu1 %v1002_v7  ;;  %2553 = vmatprep.subr.bf16.mxu0 %v2824_v2  ;;  %v2566_v7 = vpack.c.bf16 %v943_v58, %v942_v57  ;;  %v1070_v57 = vld [vmem:[%s4239_s1 + $0x3a0] sm:$0xff]  ;;  %v1075_v58 = vld [vmem:[%s4239_s1 + $0x3c8] sm:$0xff] }
  0xb9   : > { %1755 = vmatmul.mubr.f32.gmra.mrb[12].mxu0 %v1006_v8  ;;  %1309 = vmatprep.mubr.f32.mxu1 %v1011_v9  ;;  %v944_v8 = vmax.f32 %v816_v61, 0.0  ;;  %v945_v9 = vmax.f32 %v817_v62, 0.0  ;;  %v2473_v17 = vpack.c.bf16 %v881_v5, %v880_v4  ;;  %v889_v61 = vmax.f32 %v761_v53, 0.0  ;;  %v1079_v62 = vld [vmem:[%s4239_s1 + $0x3e8] sm:$0xff]  ;;  %v1078_v4 = vld [vmem:[%s4239_s1 + $0x3e0] sm:$0xff] }
  0xba   : > { %1759 = vmatprep.mubr.f32.mxu0 %v1015_v13  ;;  %2459 = vmatpush1.bf16.msra.mxu1 %v2458_v10  ;;  %v754_v10 = vld [vmem:[%s3161_s5 + $0x1c0] sm:$0xff]  ;;  %v819_v13 = vld [vmem:[%s3161_s5 + $0x3c8] sm:$0xff] }
  0xbb   : > { %2555 = vmatpush1.bf16.msra.mxu0 %v2554_v14  ;;  %2460 = vmatprep.subr.bf16.mxu1 %v2824_v2  ;;  %v1042_v14 = vld [vmem:[%s4239_s1 + $0x2c0] sm:$0xff]  ;;  %v882_v18 = vmax.f32 %v754_v10, 0.0  ;;  %v1083_v5 = vld [vmem:[%s4239_s1 + $0x408] sm:$0xff] }
  0xbc   : > { %1310 = vmatmul.mubr.f32.gmra.mrb[14].mxu1 %v1010_v21  ;;  %2556 = vmatprep.subr.bf16.mxu0 %v2824_v2  ;;  %v2569_v21 = vpack.c.bf16 %v945_v9, %v944_v8  ;;  %v1082_v9 = vld [vmem:[%s4239_s1 + $0x400] sm:$0xff] }
  0xbd   : > { %1760 = vmatmul.mubr.f32.gmra.mrb[14].mxu0 %v1014_v22  ;;  %1314 = vmatprep.mubr.f32.mxu1 %v1019_v23  ;;  %v946_v22 = vmax.f32 %v818_v12, 0.0  ;;  %v947_v23 = vmax.f32 %v819_v13, 0.0  ;;  %v2476_v31 = vpack.c.bf16 %v883_v19, %v882_v18  ;;  %v1086_v10 = vld [vmem:[%s4239_s1 + $0x420] sm:$0xff]  ;;  %v1107_v18 = vld [vmem:[%s4239_s1 + $0x4c8] sm:$0xff] }
  0xbe   : > { %1764 = vmatprep.mubr.f32.mxu0 %v1023_v27  ;;  %2462 = vmatpush1.bf16.msra.mxu1 %v2461_v24  ;;  %v756_v24 = vld [vmem:[%s3161_s5 + $0x1d0] sm:$0xff]  ;;  %v821_v27 = vld [vmem:[%s3161_s5 + $0x3d8] sm:$0xff]  ;;  %v1090_v12 = vld [vmem:[%s4239_s1 + $0x440] sm:$0xff] }
  0xbf   : > { %2558 = vmatpush1.bf16.msra.mxu0 %v2557_v28  ;;  %2463 = vmatprep.subr.bf16.mxu1 %v2824_v2  ;;  %v1050_v28 = vld [vmem:[%s4239_s1 + $0x300] sm:$0xff]  ;;  %v884_v32 = vmax.f32 %v756_v24, 0.0  ;;  %v1111_v19 = vld [vmem:[%s4239_s1 + $0x4e8] sm:$0xff] }
  0xc0   : > { %1315 = vmatmul.mubr.f32.gmra.mrb[16].mxu1 %v1018_v35  ;;  %2559 = vmatprep.subr.bf16.mxu0 %v2824_v2  ;;  %v2572_v35 = vpack.c.bf16 %v947_v23, %v946_v22  ;;  %v1094_v13 = vld [vmem:[%s4239_s1 + $0x460] sm:$0xff]  ;;  %v1115_v22 = vld [vmem:[%s4239_s1 + $0x508] sm:$0xff] }
  0xc1   : > { %1765 = vmatmul.mubr.f32.gmra.mrb[16].mxu0 %v1022_v36  ;;  %1319 = vmatprep.mubr.f32.mxu1 %v1027_v37  ;;  %v948_v36 = vmax.f32 %v820_v26, 0.0  ;;  %v949_v37 = vmax.f32 %v821_v27, 0.0  ;;  %v2479_v45 = vpack.c.bf16 %v885_v33, %v884_v32  ;;  %v1119_v23 = vld [vmem:[%s4239_s1 + $0x528] sm:$0xff]  ;;  %v1114_v24 = vld [vmem:[%s4239_s1 + $0x500] sm:$0xff] }
  0xc2   : > { %1769 = vmatprep.mubr.f32.mxu0 %v1031_v41  ;;  %2465 = vmatpush1.bf16.msra.mxu1 %v2464_v38  ;;  %v758_v38 = vld [vmem:[%s3161_s5 + $0x1e0] sm:$0xff]  ;;  %v823_v41 = vld [vmem:[%s3161_s5 + $0x3e8] sm:$0xff] }
  0xc3   : > { %2561 = vmatpush1.bf16.msra.mxu0 %v2560_v42  ;;  %2466 = vmatprep.subr.bf16.mxu1 %v2824_v2  ;;  %v1058_v42 = vld [vmem:[%s4239_s1 + $0x340] sm:$0xff]  ;;  %v886_v46 = vmax.f32 %v758_v38, 0.0  ;;  %v1123_v26 = vld [vmem:[%s4239_s1 + $0x548] sm:$0xff] }
  0xc4   : > { %1320 = vmatmul.mubr.f32.gmra.mrb[18].mxu1 %v1026_v49  ;;  %2562 = vmatprep.subr.bf16.mxu0 %v2824_v2  ;;  %v2575_v49 = vpack.c.bf16 %v949_v37, %v948_v36  ;;  %v1127_v27 = vld [vmem:[%s4239_s1 + $0x568] sm:$0xff]  ;;  %v1130_v32 = vld [vmem:[%s4239_s1 + $0x580] sm:$0xff] }
  0xc5   : > { %1770 = vmatmul.mubr.f32.gmra.mrb[18].mxu0 %v1030_v50  ;;  %1324 = vmatprep.mubr.f32.mxu1 %v1035_v51  ;;  %v950_v50 = vmax.f32 %v822_v40, 0.0  ;;  %v951_v51 = vmax.f32 %v823_v41, 0.0  ;;  %v2482_v59 = vpack.c.bf16 %v887_v47, %v886_v46  ;;  %v1134_v33 = vld [vmem:[%s4239_s1 + $0x5a0] sm:$0xff]  ;;  %v1147_v38 = vld [vmem:[%s4239_s1 + $0x608] sm:$0xff] }
  0xc6   : > { %1774 = vmatprep.mubr.f32.mxu0 %v1039_v55  ;;  %2468 = vmatpush1.bf16.msra.mxu1 %v2467_v52  ;;  %v760_v52 = vld [vmem:[%s3161_s5 + $0x1f0] sm:$0xff]  ;;  %v825_v55 = vld [vmem:[%s3161_s5 + $0x3f8] sm:$0xff]  ;;  %v1138_v36 = vld [vmem:[%s4239_s1 + $0x5c0] sm:$0xff] }
  0xc7   : > { %2564 = vmatpush1.bf16.msra.mxu0 %v2563_v56  ;;  %2469 = vmatprep.subr.bf16.mxu1 %v2824_v2  ;;  %v1066_v56 = vld [vmem:[%s4239_s1 + $0x380] sm:$0xff]  ;;  %v888_v60 = vmax.f32 %v760_v52, 0.0  ;;  %v1163_v46 = vld [vmem:[%s4239_s1 + $0x688] sm:$0xff] }
  0xc8   : > { %1325 = vmatmul.mubr.f32.gmra.mrb[20].mxu1 %v1034_v63  ;;  %2565 = vmatprep.subr.bf16.mxu0 %v2824_v2  ;;  %v2578_v63 = vpack.c.bf16 %v951_v51, %v950_v50  ;;  %v1142_v37 = vld [vmem:[%s4239_s1 + $0x5e0] sm:$0xff]  ;;  %v1167_v47 = vld [vmem:[%s4239_s1 + $0x6a8] sm:$0xff] }
  0xc9   : > { %1775 = vmatmul.mubr.f32.gmra.mrb[20].mxu0 %v1038_v0  ;;  %1329 = vmatprep.mubr.f32.mxu1 %v1043_v1  ;;  %v952_v0 = vmax.f32 %v824_v54, 0.0  ;;  %v953_v1 = vmax.f32 %v825_v55, 0.0  ;;  %v1146_v40 = vld [vmem:[%s4239_s1 + $0x600] sm:$0xff]  ;;  %v1171_v50 = vld [vmem:[%s4239_s1 + $0x6c8] sm:$0xff] }
  0xca   : > { %1779 = vmatprep.mubr.f32.mxu0 %v1047_v6  ;;  %2471 = vmatpush1.bf16.msra.mxu1 %v2470_v3  ;;  %v1074_v3 = vld [vmem:[%s4239_s1 + $0x3c0] sm:$0xff]  ;;  %v2485_v6 = vpack.c.bf16 %v889_v61, %v888_v60  ;;  %v1175_v51 = vld [vmem:[%s4239_s1 + $0x6e8] sm:$0xff] }
  0xcb   : > { %2567 = vmatpush1.bf16.msra.mxu0 %v2566_v7  ;;  %2472 = vmatprep.subr.bf16.mxu1 %v2824_v2  ;;  %v1087_v7 = vld [vmem:[%s4239_s1 + $0x428] sm:$0xff]  ;;  %v2581_v8 = vpack.c.bf16 %v953_v1, %v952_v0  ;;  %v1150_v41 = vld [vmem:[%s4239_s1 + $0x620] sm:$0xff] }
  0xcc   : > { %1330 = vmatmul.mubr.f32.gmra.mrb[22].mxu1 %v1042_v14  ;;  %2568 = vmatprep.subr.bf16.mxu0 %v2824_v2  ;;  %v1099_v14 = vld [vmem:[%s4239_s1 + $0x488] sm:$0xff]  ;;  %v1170_v52 = vld [vmem:[%s4239_s1 + $0x6c0] sm:$0xff] }
  0xcd   : > { %1780 = vmatmul.mubr.f32.gmra.mrb[22].mxu0 %v1046_v15  ;;  %1334 = vmatprep.mubr.f32.mxu1 %v1051_v16  ;;  %v1103_v15 = vld [vmem:[%s4239_s1 + $0x4a8] sm:$0xff]  ;;  %v1098_v16 = vld [vmem:[%s4239_s1 + $0x480] sm:$0xff] }
  0xce   : > { %1784 = vmatprep.mubr.f32.mxu0 %v1055_v20  ;;  %2474 = vmatpush1.bf16.msra.mxu1 %v2473_v17  ;;  %v1102_v17 = vld [vmem:[%s4239_s1 + $0x4a0] sm:$0xff]  ;;  %v1179_v54 = vld [vmem:[%s4239_s1 + $0x708] sm:$0xff] }
  0xcf   : > { %2570 = vmatpush1.bf16.msra.mxu0 %v2569_v21  ;;  %2475 = vmatprep.subr.bf16.mxu1 %v2824_v2  ;;  %v1106_v20 = vld [vmem:[%s4239_s1 + $0x4c0] sm:$0xff]  ;;  %v1183_v55 = vld [vmem:[%s4239_s1 + $0x728] sm:$0xff] }
  0xd0   : > { %1335 = vmatmul.mubr.f32.gmra.mrb[24].mxu1 %v1050_v28  ;;  %2571 = vmatprep.subr.bf16.mxu0 %v2824_v2  ;;  %v1110_v21 = vld [vmem:[%s4239_s1 + $0x4e0] sm:$0xff] }
  0xd1   : > { %1785 = vmatmul.mubr.f32.gmra.mrb[24].mxu0 %v1054_v29  ;;  %1339 = vmatprep.mubr.f32.mxu1 %v1059_v30  ;;  %v1122_v28 = vld [vmem:[%s4239_s1 + $0x540] sm:$0xff]  ;;  %v1131_v30 = vld [vmem:[%s4239_s1 + $0x588] sm:$0xff] }
  0xd2   : > { %1789 = vmatprep.mubr.f32.mxu0 %v1063_v34  ;;  %2477 = vmatpush1.bf16.msra.mxu1 %v2476_v31  ;;  %v1126_v29 = vld [vmem:[%s4239_s1 + $0x560] sm:$0xff]  ;;  %v1135_v31 = vld [vmem:[%s4239_s1 + $0x5a8] sm:$0xff] }
  0xd3   : > { %2573 = vmatpush1.bf16.msra.mxu0 %v2572_v35  ;;  %2478 = vmatprep.subr.bf16.mxu1 %v2824_v2  ;;  %v1139_v34 = vld [vmem:[%s4239_s1 + $0x5c8] sm:$0xff]  ;;  %v1174_v53 = vld [vmem:[%s4239_s1 + $0x6e0] sm:$0xff] }
  0xd4   : > { %1340 = vmatmul.mubr.f32.gmra.mrb[26].mxu1 %v1058_v42  ;;  %2574 = vmatprep.subr.bf16.mxu0 %v2824_v2  ;;  %v1143_v35 = vld [vmem:[%s4239_s1 + $0x5e8] sm:$0xff]  ;;  %v1186_v60 = vld [vmem:[%s4239_s1 + $0x740] sm:$0xff] }
  0xd5   : > { %1790 = vmatmul.mubr.f32.gmra.mrb[26].mxu0 %v1062_v43  ;;  %1344 = vmatprep.mubr.f32.mxu1 %v1067_v44  ;;  %v1155_v42 = vld [vmem:[%s4239_s1 + $0x648] sm:$0xff]  ;;  %v1154_v44 = vld [vmem:[%s4239_s1 + $0x640] sm:$0xff] }
  0xd6   : > { %1794 = vmatprep.mubr.f32.mxu0 %v1071_v48  ;;  %2480 = vmatpush1.bf16.msra.mxu1 %v2479_v45  ;;  %v1159_v43 = vld [vmem:[%s4239_s1 + $0x668] sm:$0xff]  ;;  %v1158_v45 = vld [vmem:[%s4239_s1 + $0x660] sm:$0xff] }
  0xd7   : > { %2576 = vmatpush1.bf16.msra.mxu0 %v2575_v49  ;;  %2481 = vmatprep.subr.bf16.mxu1 %v2824_v2  ;;  %v1162_v48 = vld [vmem:[%s4239_s1 + $0x680] sm:$0xff] }
  0xd8   : > { %1345 = vmatmul.mubr.f32.gmra.mrb[28].mxu1 %v1066_v56  ;;  %2577 = vmatprep.subr.bf16.mxu0 %v2824_v2  ;;  %v1166_v49 = vld [vmem:[%s4239_s1 + $0x6a0] sm:$0xff] }
  0xd9   : > { %1795 = vmatmul.mubr.f32.gmra.mrb[28].mxu0 %v1070_v57  ;;  %1349 = vmatprep.mubr.f32.mxu1 %v1075_v58  ;;  %v1178_v56 = vld [vmem:[%s4239_s1 + $0x700] sm:$0xff]  ;;  %v1187_v58 = vld [vmem:[%s4239_s1 + $0x748] sm:$0xff] }
  0xda   : > { %1799 = vmatprep.mubr.f32.mxu0 %v1079_v62  ;;  %2483 = vmatpush1.bf16.msra.mxu1 %v2482_v59  ;;  %v1182_v57 = vld [vmem:[%s4239_s1 + $0x720] sm:$0xff]  ;;  %v1191_v59 = vld [vmem:[%s4239_s1 + $0x768] sm:$0xff] }
  0xdb   : > { %2579 = vmatpush1.bf16.msra.mxu0 %v2578_v63  ;;  %2484 = vmatprep.subr.bf16.mxu1 %v2824_v2  ;;  %v1190_v61 = vld [vmem:[%s4239_s1 + $0x760] sm:$0xff]  ;;  %v1195_v62 = vld [vmem:[%s4239_s1 + $0x788] sm:$0xff] }
  0xdc   : > { %1350 = vmatmul.mubr.f32.gmra.mrb[30].mxu1 %v1074_v3  ;;  %2580 = vmatprep.subr.bf16.mxu0 %v2824_v2  ;;  %v1095_v2 = vld [vmem:[%s4239_s1 + $0x468] sm:$0xff]  ;;  %v1194_v0 = vld [vmem:[%s4239_s1 + $0x780] sm:$0xff] }
  0xdd   : > { %1800 = vmatmul.mubr.f32.gmra.mrb[30].mxu0 %v1078_v4  ;;  %1354 = vmatprep.mubr.f32.mxu1 %v1083_v5  ;;  %v1199_v63 = vld [vmem:[%s4239_s1 + $0x7a8] sm:$0xff]  ;;  %v1198_v1 = vld [vmem:[%s4239_s1 + $0x7a0] sm:$0xff] }
  0xde   : > { %1804 = vmatprep.mubr.f32.mxu0 %v1087_v7  ;;  %2486 = vmatpush1.bf16.msra.mxu1 %v2485_v6  ;;  %v1203_v3 = vld [vmem:[%s4239_s1 + $0x7c8] sm:$0xff]  ;;  %v1202_v5 = vld [vmem:[%s4239_s1 + $0x7c0] sm:$0xff]  ;;  %v957_v7 = vld [vmem:[%s4239_s1 + $0x18] sm:$0xff] }
  0xdf   : > { %2582 = vmatpush1.bf16.msra.mxu0 %v2581_v8  ;;  %v1207_v4 = vld [vmem:[%s4239_s1 + $0x7e8] sm:$0xff]  ;;  %v1206_v6 = vld [vmem:[%s4239_s1 + $0x7e0] sm:$0xff]  ;;  %v961_v8 = vld [vmem:[%s4239_s1 + $0x38] sm:$0xff] }
  0xe0   : > { %1355 = vmatmul.mubr.f32.gmra.mrb[32].mxu1 %v1082_v9  ;;  %v956_v9 = vld [vmem:[%s4239_s1 + $0x10] sm:$0xff] }
  0xe1   : > { %1805 = vmatmul.mubr.f32.gmra.mrb[32].mxu0 %v1086_v10  ;;  %1359 = vmatprep.mubr.f32.mxu1 %v1091_v11  ;;  %v960_v10 = vld [vmem:[%s4239_s1 + $0x30] sm:$0xff]  ;;  %v965_v11 = vld [vmem:[%s4239_s1 + $0x58] sm:$0xff] }
  0xe2   : > { %1809 = vmatprep.mubr.f32.mxu0 %v1095_v2  ;;  %v969_v2 = vld [vmem:[%s4239_s1 + $0x78] sm:$0xff] }
  0xe4   : > { %1360 = vmatmul.mubr.f32.gmra.mrb[34].mxu1 %v1090_v12  ;;  %v964_v12 = vld [vmem:[%s4239_s1 + $0x50] sm:$0xff] }
  0xe5   : > { %1810 = vmatmul.mubr.f32.gmra.mrb[34].mxu0 %v1094_v13  ;;  %1364 = vmatprep.mubr.f32.mxu1 %v1099_v14  ;;  %v968_v13 = vld [vmem:[%s4239_s1 + $0x70] sm:$0xff]  ;;  %v973_v14 = vld [vmem:[%s4239_s1 + $0x98] sm:$0xff] }
  0xe6   : > { %1814 = vmatprep.mubr.f32.mxu0 %v1103_v15  ;;  %v977_v15 = vld [vmem:[%s4239_s1 + $0xb8] sm:$0xff] }
  0xe8   : > { %1365 = vmatmul.mubr.f32.gmra.mrb[36].mxu1 %v1098_v16  ;;  %v972_v16 = vld [vmem:[%s4239_s1 + $0x90] sm:$0xff] }
  0xe9   : > { %1815 = vmatmul.mubr.f32.gmra.mrb[36].mxu0 %v1102_v17  ;;  %1369 = vmatprep.mubr.f32.mxu1 %v1107_v18  ;;  %v976_v17 = vld [vmem:[%s4239_s1 + $0xb0] sm:$0xff]  ;;  %v981_v18 = vld [vmem:[%s4239_s1 + $0xd8] sm:$0xff] }
  0xea   : > { %1819 = vmatprep.mubr.f32.mxu0 %v1111_v19  ;;  %v985_v19 = vld [vmem:[%s4239_s1 + $0xf8] sm:$0xff] }
  0xec   : > { %1370 = vmatmul.mubr.f32.gmra.mrb[38].mxu1 %v1106_v20  ;;  %v980_v20 = vld [vmem:[%s4239_s1 + $0xd0] sm:$0xff] }
  0xed   : > { %1820 = vmatmul.mubr.f32.gmra.mrb[38].mxu0 %v1110_v21  ;;  %1374 = vmatprep.mubr.f32.mxu1 %v1115_v22  ;;  %v984_v21 = vld [vmem:[%s4239_s1 + $0xf0] sm:$0xff]  ;;  %v989_v22 = vld [vmem:[%s4239_s1 + $0x118] sm:$0xff] }
  0xee   : > { %1824 = vmatprep.mubr.f32.mxu0 %v1119_v23  ;;  %v993_v23 = vld [vmem:[%s4239_s1 + $0x138] sm:$0xff] }
  0xf0   : > { %1375 = vmatmul.mubr.f32.gmra.mrb[40].mxu1 %v1114_v24  ;;  %v988_v24 = vld [vmem:[%s4239_s1 + $0x110] sm:$0xff] }
  0xf1   : > { %1825 = vmatmul.mubr.f32.gmra.mrb[40].mxu0 %v1118_v25  ;;  %1379 = vmatprep.mubr.f32.mxu1 %v1123_v26  ;;  %v992_v25 = vld [vmem:[%s4239_s1 + $0x130] sm:$0xff]  ;;  %v997_v26 = vld [vmem:[%s4239_s1 + $0x158] sm:$0xff] }
  0xf2   : > { %1829 = vmatprep.mubr.f32.mxu0 %v1127_v27  ;;  %v1001_v27 = vld [vmem:[%s4239_s1 + $0x178] sm:$0xff] }
  0xf4   : > { %1380 = vmatmul.mubr.f32.gmra.mrb[42].mxu1 %v1122_v28  ;;  %v996_v28 = vld [vmem:[%s4239_s1 + $0x150] sm:$0xff] }
  0xf5   : > { %1830 = vmatmul.mubr.f32.gmra.mrb[42].mxu0 %v1126_v29  ;;  %1384 = vmatprep.mubr.f32.mxu1 %v1131_v30  ;;  %v1000_v29 = vld [vmem:[%s4239_s1 + $0x170] sm:$0xff]  ;;  %v1005_v30 = vld [vmem:[%s4239_s1 + $0x198] sm:$0xff] }
  0xf6   : > { %1834 = vmatprep.mubr.f32.mxu0 %v1135_v31  ;;  %v1009_v31 = vld [vmem:[%s4239_s1 + $0x1b8] sm:$0xff] }
  0xf8   : > { %1385 = vmatmul.mubr.f32.gmra.mrb[44].mxu1 %v1130_v32  ;;  %v1004_v32 = vld [vmem:[%s4239_s1 + $0x190] sm:$0xff] }
  0xf9   : > { %1835 = vmatmul.mubr.f32.gmra.mrb[44].mxu0 %v1134_v33  ;;  %1389 = vmatprep.mubr.f32.mxu1 %v1139_v34  ;;  %v1008_v33 = vld [vmem:[%s4239_s1 + $0x1b0] sm:$0xff]  ;;  %v1013_v34 = vld [vmem:[%s4239_s1 + $0x1d8] sm:$0xff] }
  0xfa   : > { %1839 = vmatprep.mubr.f32.mxu0 %v1143_v35  ;;  %v1017_v35 = vld [vmem:[%s4239_s1 + $0x1f8] sm:$0xff] }
  0xfc   : > { %1390 = vmatmul.mubr.f32.gmra.mrb[46].mxu1 %v1138_v36  ;;  %v1012_v36 = vld [vmem:[%s4239_s1 + $0x1d0] sm:$0xff] }
  0xfd   : > { %1840 = vmatmul.mubr.f32.gmra.mrb[46].mxu0 %v1142_v37  ;;  %1394 = vmatprep.mubr.f32.mxu1 %v1147_v38  ;;  %v1016_v37 = vld [vmem:[%s4239_s1 + $0x1f0] sm:$0xff]  ;;  %v1021_v38 = vld [vmem:[%s4239_s1 + $0x218] sm:$0xff] }
  0xfe   : > { %1844 = vmatprep.mubr.f32.mxu0 %v1151_v39  ;;  %v1025_v39 = vld [vmem:[%s4239_s1 + $0x238] sm:$0xff] }
 0x100   : > { %1395 = vmatmul.mubr.f32.gmra.mrb[48].mxu1 %v1146_v40  ;;  %v1020_v40 = vld [vmem:[%s4239_s1 + $0x210] sm:$0xff] }
 0x101   : > { %1845 = vmatmul.mubr.f32.gmra.mrb[48].mxu0 %v1150_v41  ;;  %1399 = vmatprep.mubr.f32.mxu1 %v1155_v42  ;;  %v1024_v41 = vld [vmem:[%s4239_s1 + $0x230] sm:$0xff]  ;;  %v1029_v42 = vld [vmem:[%s4239_s1 + $0x258] sm:$0xff] }
 0x102   : > { %1849 = vmatprep.mubr.f32.mxu0 %v1159_v43  ;;  %v1033_v43 = vld [vmem:[%s4239_s1 + $0x278] sm:$0xff] }
 0x104   : > { %1400 = vmatmul.mubr.f32.gmra.mrb[50].mxu1 %v1154_v44  ;;  %v1028_v44 = vld [vmem:[%s4239_s1 + $0x250] sm:$0xff] }
 0x105   : > { %1850 = vmatmul.mubr.f32.gmra.mrb[50].mxu0 %v1158_v45  ;;  %1404 = vmatprep.mubr.f32.mxu1 %v1163_v46  ;;  %v1032_v45 = vld [vmem:[%s4239_s1 + $0x270] sm:$0xff]  ;;  %v1037_v46 = vld [vmem:[%s4239_s1 + $0x298] sm:$0xff] }
 0x106   : > { %1854 = vmatprep.mubr.f32.mxu0 %v1167_v47  ;;  %v1041_v47 = vld [vmem:[%s4239_s1 + $0x2b8] sm:$0xff] }
 0x108   : > { %1405 = vmatmul.mubr.f32.gmra.mrb[52].mxu1 %v1162_v48  ;;  %v1036_v48 = vld [vmem:[%s4239_s1 + $0x290] sm:$0xff] }
 0x109   : > { %1855 = vmatmul.mubr.f32.gmra.mrb[52].mxu0 %v1166_v49  ;;  %1409 = vmatprep.mubr.f32.mxu1 %v1171_v50  ;;  %v1040_v49 = vld [vmem:[%s4239_s1 + $0x2b0] sm:$0xff]  ;;  %v1045_v50 = vld [vmem:[%s4239_s1 + $0x2d8] sm:$0xff] }
 0x10a   : > { %1859 = vmatprep.mubr.f32.mxu0 %v1175_v51  ;;  %v1049_v51 = vld [vmem:[%s4239_s1 + $0x2f8] sm:$0xff] }
 0x10c   : > { %1410 = vmatmul.mubr.f32.gmra.mrb[54].mxu1 %v1170_v52  ;;  %v1044_v52 = vld [vmem:[%s4239_s1 + $0x2d0] sm:$0xff] }
 0x10d   : > { %1860 = vmatmul.mubr.f32.gmra.mrb[54].mxu0 %v1174_v53  ;;  %1414 = vmatprep.mubr.f32.mxu1 %v1179_v54  ;;  %v1048_v53 = vld [vmem:[%s4239_s1 + $0x2f0] sm:$0xff]  ;;  %v1053_v54 = vld [vmem:[%s4239_s1 + $0x318] sm:$0xff] }
 0x10e   : > { %1864 = vmatprep.mubr.f32.mxu0 %v1183_v55  ;;  %v1057_v55 = vld [vmem:[%s4239_s1 + $0x338] sm:$0xff] }
 0x110   : > { %1415 = vmatmul.mubr.f32.gmra.mrb[56].mxu1 %v1178_v56  ;;  %v1052_v56 = vld [vmem:[%s4239_s1 + $0x310] sm:$0xff] }
 0x111   : > { %1865 = vmatmul.mubr.f32.gmra.mrb[56].mxu0 %v1182_v57  ;;  %1419 = vmatprep.mubr.f32.mxu1 %v1187_v58  ;;  %v1056_v57 = vld [vmem:[%s4239_s1 + $0x330] sm:$0xff]  ;;  %v1061_v58 = vld [vmem:[%s4239_s1 + $0x358] sm:$0xff] }
 0x112   : > { %1869 = vmatprep.mubr.f32.mxu0 %v1191_v59  ;;  %v1065_v59 = vld [vmem:[%s4239_s1 + $0x378] sm:$0xff] }
 0x114   : > { %1420 = vmatmul.mubr.f32.gmra.mrb[58].mxu1 %v1186_v60  ;;  %v1060_v60 = vld [vmem:[%s4239_s1 + $0x350] sm:$0xff] }
 0x115   : > { %1870 = vmatmul.mubr.f32.gmra.mrb[58].mxu0 %v1190_v61  ;;  %1424 = vmatprep.mubr.f32.mxu1 %v1195_v62  ;;  %v1064_v61 = vld [vmem:[%s4239_s1 + $0x370] sm:$0xff]  ;;  %v1069_v62 = vld [vmem:[%s4239_s1 + $0x398] sm:$0xff] }
 0x116   : > { %1874 = vmatprep.mubr.f32.mxu0 %v1199_v63  ;;  %v1073_v63 = vld [vmem:[%s4239_s1 + $0x3b8] sm:$0xff] }
 0x118   : > { %1425 = vmatmul.mubr.f32.gmra.mrb[60].mxu1 %v1194_v0  ;;  %v1068_v0 = vld [vmem:[%s4239_s1 + $0x390] sm:$0xff] }
 0x119   : > { %1875 = vmatmul.mubr.f32.gmra.mrb[60].mxu0 %v1198_v1  ;;  %1429 = vmatprep.mubr.f32.mxu1 %v1203_v3  ;;  %v1072_v1 = vld [vmem:[%s4239_s1 + $0x3b0] sm:$0xff]  ;;  %v1077_v3 = vld [vmem:[%s4239_s1 + $0x3d8] sm:$0xff] }
 0x11a   : > { %1879 = vmatprep.mubr.f32.mxu0 %v1207_v4  ;;  %v1081_v4 = vld [vmem:[%s4239_s1 + $0x3f8] sm:$0xff] }
 0x11c   : > { %1430 = vmatmul.mubr.f32.gmra.mrb[62].mxu1 %v1202_v5  ;;  %v1076_v5 = vld [vmem:[%s4239_s1 + $0x3d0] sm:$0xff] }
 0x11d   : > { %1880 = vmatmul.mubr.f32.gmra.mrb[62].mxu0 %v1206_v6  ;;  %1499 = vmatprep.mubr.f32.mxu1 %v957_v7  ;;  %v1080_v6 = vld [vmem:[%s4239_s1 + $0x3f0] sm:$0xff]  ;;  %v1085_v7 = vld [vmem:[%s4239_s1 + $0x418] sm:$0xff] }
 0x11e   : > { %1949 = vmatprep.mubr.f32.mxu0 %v961_v8  ;;  %v1089_v8 = vld [vmem:[%s4239_s1 + $0x438] sm:$0xff] }
 0x120   : > { %1500 = vmatmul.mubr.f32.vlgmr.msra.gmra.mrb[0].mxu1 %v956_v9  ;;  %v1084_v9 = vld [vmem:[%s4239_s1 + $0x410] sm:$0xff] }
 0x121   : > { %1950 = vmatmul.mubr.f32.vlgmr.msra.gmra.mrb[0].mxu0 %v960_v10  ;;  %1504 = vmatprep.mubr.f32.mxu1 %v965_v11  ;;  %v1088_v10 = vld [vmem:[%s4239_s1 + $0x430] sm:$0xff]  ;;  %v1093_v11 = vld [vmem:[%s4239_s1 + $0x458] sm:$0xff] }
 0x122   : > { %1954 = vmatprep.mubr.f32.mxu0 %v969_v2  ;;  %v1097_v2 = vld [vmem:[%s4239_s1 + $0x478] sm:$0xff] }
 0x124   : > { %1505 = vmatmul.mubr.f32.gmra.mrb[2].mxu1 %v964_v12  ;;  %v1092_v12 = vld [vmem:[%s4239_s1 + $0x450] sm:$0xff] }
 0x125   : > { %1955 = vmatmul.mubr.f32.gmra.mrb[2].mxu0 %v968_v13  ;;  %1509 = vmatprep.mubr.f32.mxu1 %v973_v14  ;;  %v1096_v13 = vld [vmem:[%s4239_s1 + $0x470] sm:$0xff]  ;;  %v1101_v14 = vld [vmem:[%s4239_s1 + $0x498] sm:$0xff] }
 0x126   : > { %1959 = vmatprep.mubr.f32.mxu0 %v977_v15  ;;  %v1105_v15 = vld [vmem:[%s4239_s1 + $0x4b8] sm:$0xff] }
 0x128   : > { %1510 = vmatmul.mubr.f32.gmra.mrb[4].mxu1 %v972_v16  ;;  %v1100_v16 = vld [vmem:[%s4239_s1 + $0x490] sm:$0xff] }
 0x129   : > { %1960 = vmatmul.mubr.f32.gmra.mrb[4].mxu0 %v976_v17  ;;  %1514 = vmatprep.mubr.f32.mxu1 %v981_v18  ;;  %v1104_v17 = vld [vmem:[%s4239_s1 + $0x4b0] sm:$0xff]  ;;  %v1109_v18 = vld [vmem:[%s4239_s1 + $0x4d8] sm:$0xff] }
 0x12a   : > { %1964 = vmatprep.mubr.f32.mxu0 %v985_v19  ;;  %v1113_v19 = vld [vmem:[%s4239_s1 + $0x4f8] sm:$0xff] }
 0x12c   : > { %1515 = vmatmul.mubr.f32.gmra.mrb[6].mxu1 %v980_v20  ;;  %v1108_v20 = vld [vmem:[%s4239_s1 + $0x4d0] sm:$0xff] }
 0x12d   : > { %1965 = vmatmul.mubr.f32.gmra.mrb[6].mxu0 %v984_v21  ;;  %1519 = vmatprep.mubr.f32.mxu1 %v989_v22  ;;  %v1112_v21 = vld [vmem:[%s4239_s1 + $0x4f0] sm:$0xff]  ;;  %v1117_v22 = vld [vmem:[%s4239_s1 + $0x518] sm:$0xff] }
 0x12e   : > { %1969 = vmatprep.mubr.f32.mxu0 %v993_v23  ;;  %v1121_v23 = vld [vmem:[%s4239_s1 + $0x538] sm:$0xff] }
 0x130   : > { %1520 = vmatmul.mubr.f32.gmra.mrb[8].mxu1 %v988_v24  ;;  %v1116_v24 = vld [vmem:[%s4239_s1 + $0x510] sm:$0xff] }
 0x131   : > { %1970 = vmatmul.mubr.f32.gmra.mrb[8].mxu0 %v992_v25  ;;  %1524 = vmatprep.mubr.f32.mxu1 %v997_v26  ;;  %v1120_v25 = vld [vmem:[%s4239_s1 + $0x530] sm:$0xff]  ;;  %v1125_v26 = vld [vmem:[%s4239_s1 + $0x558] sm:$0xff] }
 0x132   : > { %1974 = vmatprep.mubr.f32.mxu0 %v1001_v27  ;;  %v1129_v27 = vld [vmem:[%s4239_s1 + $0x578] sm:$0xff] }
 0x134   : > { %1525 = vmatmul.mubr.f32.gmra.mrb[10].mxu1 %v996_v28  ;;  %v1124_v28 = vld [vmem:[%s4239_s1 + $0x550] sm:$0xff] }
 0x135   : > { %1975 = vmatmul.mubr.f32.gmra.mrb[10].mxu0 %v1000_v29  ;;  %1529 = vmatprep.mubr.f32.mxu1 %v1005_v30  ;;  %v1128_v29 = vld [vmem:[%s4239_s1 + $0x570] sm:$0xff]  ;;  %v1133_v30 = vld [vmem:[%s4239_s1 + $0x598] sm:$0xff] }
 0x136   : > { %1979 = vmatprep.mubr.f32.mxu0 %v1009_v31  ;;  %v1137_v31 = vld [vmem:[%s4239_s1 + $0x5b8] sm:$0xff] }
 0x138   : > { %1530 = vmatmul.mubr.f32.gmra.mrb[12].mxu1 %v1004_v32  ;;  %v1132_v32 = vld [vmem:[%s4239_s1 + $0x590] sm:$0xff] }
 0x139   : > { %1980 = vmatmul.mubr.f32.gmra.mrb[12].mxu0 %v1008_v33  ;;  %1534 = vmatprep.mubr.f32.mxu1 %v1013_v34  ;;  %v1136_v33 = vld [vmem:[%s4239_s1 + $0x5b0] sm:$0xff]  ;;  %v1141_v34 = vld [vmem:[%s4239_s1 + $0x5d8] sm:$0xff] }
 0x13a   : > { %1984 = vmatprep.mubr.f32.mxu0 %v1017_v35  ;;  %v1145_v35 = vld [vmem:[%s4239_s1 + $0x5f8] sm:$0xff] }
 0x13c   : > { %1535 = vmatmul.mubr.f32.gmra.mrb[14].mxu1 %v1012_v36  ;;  %v1140_v36 = vld [vmem:[%s4239_s1 + $0x5d0] sm:$0xff] }
 0x13d   : > { %1985 = vmatmul.mubr.f32.gmra.mrb[14].mxu0 %v1016_v37  ;;  %1539 = vmatprep.mubr.f32.mxu1 %v1021_v38  ;;  %v1144_v37 = vld [vmem:[%s4239_s1 + $0x5f0] sm:$0xff]  ;;  %v1149_v38 = vld [vmem:[%s4239_s1 + $0x618] sm:$0xff] }
 0x13e   : > { %1989 = vmatprep.mubr.f32.mxu0 %v1025_v39  ;;  %v1153_v39 = vld [vmem:[%s4239_s1 + $0x638] sm:$0xff] }
 0x140   : > { %1540 = vmatmul.mubr.f32.gmra.mrb[16].mxu1 %v1020_v40  ;;  %v1148_v40 = vld [vmem:[%s4239_s1 + $0x610] sm:$0xff] }
 0x141   : > { %1990 = vmatmul.mubr.f32.gmra.mrb[16].mxu0 %v1024_v41  ;;  %1544 = vmatprep.mubr.f32.mxu1 %v1029_v42  ;;  %v1152_v41 = vld [vmem:[%s4239_s1 + $0x630] sm:$0xff]  ;;  %v1157_v42 = vld [vmem:[%s4239_s1 + $0x658] sm:$0xff] }
 0x142   : > { %1994 = vmatprep.mubr.f32.mxu0 %v1033_v43  ;;  %v1161_v43 = vld [vmem:[%s4239_s1 + $0x678] sm:$0xff] }
 0x144   : > { %1545 = vmatmul.mubr.f32.gmra.mrb[18].mxu1 %v1028_v44  ;;  %v1156_v44 = vld [vmem:[%s4239_s1 + $0x650] sm:$0xff] }
 0x145   : > { %1995 = vmatmul.mubr.f32.gmra.mrb[18].mxu0 %v1032_v45  ;;  %1549 = vmatprep.mubr.f32.mxu1 %v1037_v46  ;;  %v1160_v45 = vld [vmem:[%s4239_s1 + $0x670] sm:$0xff]  ;;  %v1165_v46 = vld [vmem:[%s4239_s1 + $0x698] sm:$0xff] }
 0x146   : > { %1999 = vmatprep.mubr.f32.mxu0 %v1041_v47  ;;  %v1169_v47 = vld [vmem:[%s4239_s1 + $0x6b8] sm:$0xff] }
 0x148   : > { %1550 = vmatmul.mubr.f32.gmra.mrb[20].mxu1 %v1036_v48  ;;  %v1164_v48 = vld [vmem:[%s4239_s1 + $0x690] sm:$0xff] }
 0x149   : > { %2000 = vmatmul.mubr.f32.gmra.mrb[20].mxu0 %v1040_v49  ;;  %1554 = vmatprep.mubr.f32.mxu1 %v1045_v50  ;;  %v1168_v49 = vld [vmem:[%s4239_s1 + $0x6b0] sm:$0xff]  ;;  %v1173_v50 = vld [vmem:[%s4239_s1 + $0x6d8] sm:$0xff] }
 0x14a   : > { %2004 = vmatprep.mubr.f32.mxu0 %v1049_v51  ;;  %v1177_v51 = vld [vmem:[%s4239_s1 + $0x6f8] sm:$0xff] }
 0x14c   : > { %1555 = vmatmul.mubr.f32.gmra.mrb[22].mxu1 %v1044_v52  ;;  %v1172_v52 = vld [vmem:[%s4239_s1 + $0x6d0] sm:$0xff] }
 0x14d   : > { %2005 = vmatmul.mubr.f32.gmra.mrb[22].mxu0 %v1048_v53  ;;  %1559 = vmatprep.mubr.f32.mxu1 %v1053_v54  ;;  %v1176_v53 = vld [vmem:[%s4239_s1 + $0x6f0] sm:$0xff]  ;;  %v1181_v54 = vld [vmem:[%s4239_s1 + $0x718] sm:$0xff] }
 0x14e   : > { %2009 = vmatprep.mubr.f32.mxu0 %v1057_v55  ;;  %v1185_v55 = vld [vmem:[%s4239_s1 + $0x738] sm:$0xff] }
 0x150   : > { %1560 = vmatmul.mubr.f32.gmra.mrb[24].mxu1 %v1052_v56  ;;  %v1180_v56 = vld [vmem:[%s4239_s1 + $0x710] sm:$0xff] }
 0x151   : > { %2010 = vmatmul.mubr.f32.gmra.mrb[24].mxu0 %v1056_v57  ;;  %1564 = vmatprep.mubr.f32.mxu1 %v1061_v58  ;;  %v1184_v57 = vld [vmem:[%s4239_s1 + $0x730] sm:$0xff]  ;;  %v1189_v58 = vld [vmem:[%s4239_s1 + $0x758] sm:$0xff] }
 0x152   : > { %2014 = vmatprep.mubr.f32.mxu0 %v1065_v59  ;;  %v1193_v59 = vld [vmem:[%s4239_s1 + $0x778] sm:$0xff] }
 0x154   : > { %1565 = vmatmul.mubr.f32.gmra.mrb[26].mxu1 %v1060_v60  ;;  %v1188_v60 = vld [vmem:[%s4239_s1 + $0x750] sm:$0xff] }
 0x155   : > { %2015 = vmatmul.mubr.f32.gmra.mrb[26].mxu0 %v1064_v61  ;;  %1569 = vmatprep.mubr.f32.mxu1 %v1069_v62  ;;  %v1192_v61 = vld [vmem:[%s4239_s1 + $0x770] sm:$0xff]  ;;  %v1197_v62 = vld [vmem:[%s4239_s1 + $0x798] sm:$0xff] }
 0x156   : > { %2019 = vmatprep.mubr.f32.mxu0 %v1073_v63  ;;  %v1201_v63 = vld [vmem:[%s4239_s1 + $0x7b8] sm:$0xff] }
 0x158   : > { %1570 = vmatmul.mubr.f32.gmra.mrb[28].mxu1 %v1068_v0  ;;  %v1196_v0 = vld [vmem:[%s4239_s1 + $0x790] sm:$0xff] }
 0x159   : > { %2020 = vmatmul.mubr.f32.gmra.mrb[28].mxu0 %v1072_v1  ;;  %1574 = vmatprep.mubr.f32.mxu1 %v1077_v3  ;;  %v1200_v1 = vld [vmem:[%s4239_s1 + $0x7b0] sm:$0xff]  ;;  %v1205_v3 = vld [vmem:[%s4239_s1 + $0x7d8] sm:$0xff] }
 0x15a   : > { %2024 = vmatprep.mubr.f32.mxu0 %v1081_v4  ;;  %v1209_v4 = vld [vmem:[%s4239_s1 + $0x7f8] sm:$0xff] }
 0x15c   : > { %1575 = vmatmul.mubr.f32.gmra.mrb[30].mxu1 %v1076_v5  ;;  %v1204_v5 = vld [vmem:[%s4239_s1 + $0x7d0] sm:$0xff] }
 0x15d   : > { %2025 = vmatmul.mubr.f32.gmra.mrb[30].mxu0 %v1080_v6  ;;  %1579 = vmatprep.mubr.f32.mxu1 %v1085_v7  ;;  %v1208_v6 = vld [vmem:[%s4239_s1 + $0x7f0] sm:$0xff] }
 0x15e   : > { %2029 = vmatprep.mubr.f32.mxu0 %v1089_v8 }
 0x160   : > { %1580 = vmatmul.mubr.f32.gmra.mrb[32].mxu1 %v1084_v9 }
 0x161   : > { %2030 = vmatmul.mubr.f32.gmra.mrb[32].mxu0 %v1088_v10  ;;  %1584 = vmatprep.mubr.f32.mxu1 %v1093_v11 }
 0x162   : > { %2034 = vmatprep.mubr.f32.mxu0 %v1097_v2 }
 0x164   : > { %1585 = vmatmul.mubr.f32.gmra.mrb[34].mxu1 %v1092_v12 }
 0x165   : > { %2035 = vmatmul.mubr.f32.gmra.mrb[34].mxu0 %v1096_v13  ;;  %1589 = vmatprep.mubr.f32.mxu1 %v1101_v14 }
 0x166   : > { %2039 = vmatprep.mubr.f32.mxu0 %v1105_v15 }
 0x168   : > { %1590 = vmatmul.mubr.f32.gmra.mrb[36].mxu1 %v1100_v16 }
 0x169   : > { %2040 = vmatmul.mubr.f32.gmra.mrb[36].mxu0 %v1104_v17  ;;  %1594 = vmatprep.mubr.f32.mxu1 %v1109_v18 }
 0x16a   : > { %2044 = vmatprep.mubr.f32.mxu0 %v1113_v19 }
 0x16c   : > { %1595 = vmatmul.mubr.f32.gmra.mrb[38].mxu1 %v1108_v20 }
 0x16d   : > { %2045 = vmatmul.mubr.f32.gmra.mrb[38].mxu0 %v1112_v21  ;;  %1599 = vmatprep.mubr.f32.mxu1 %v1117_v22 }
 0x16e   : > { %2049 = vmatprep.mubr.f32.mxu0 %v1121_v23 }
 0x170   : > { %1600 = vmatmul.mubr.f32.gmra.mrb[40].mxu1 %v1116_v24 }
 0x171   : > { %2050 = vmatmul.mubr.f32.gmra.mrb[40].mxu0 %v1120_v25  ;;  %1604 = vmatprep.mubr.f32.mxu1 %v1125_v26 }
 0x172   : > { %2054 = vmatprep.mubr.f32.mxu0 %v1129_v27 }
 0x174   : > { %1605 = vmatmul.mubr.f32.gmra.mrb[42].mxu1 %v1124_v28 }
 0x175   : > { %2055 = vmatmul.mubr.f32.gmra.mrb[42].mxu0 %v1128_v29  ;;  %1609 = vmatprep.mubr.f32.mxu1 %v1133_v30 }
 0x176   : > { %2059 = vmatprep.mubr.f32.mxu0 %v1137_v31 }
 0x178   : > { %1610 = vmatmul.mubr.f32.gmra.mrb[44].mxu1 %v1132_v32 }
 0x179   : > { %2060 = vmatmul.mubr.f32.gmra.mrb[44].mxu0 %v1136_v33  ;;  %1614 = vmatprep.mubr.f32.mxu1 %v1141_v34 }
 0x17a   : > { %2064 = vmatprep.mubr.f32.mxu0 %v1145_v35 }
 0x17c   : > { %1615 = vmatmul.mubr.f32.gmra.mrb[46].mxu1 %v1140_v36 }
 0x17d   : > { %2065 = vmatmul.mubr.f32.gmra.mrb[46].mxu0 %v1144_v37  ;;  %1619 = vmatprep.mubr.f32.mxu1 %v1149_v38 }
 0x17e   : > { %2069 = vmatprep.mubr.f32.mxu0 %v1153_v39 }
 0x180   : > { %1620 = vmatmul.mubr.f32.gmra.mrb[48].mxu1 %v1148_v40 }
 0x181   : > { %2070 = vmatmul.mubr.f32.gmra.mrb[48].mxu0 %v1152_v41  ;;  %1624 = vmatprep.mubr.f32.mxu1 %v1157_v42 }
 0x182   : > { %2074 = vmatprep.mubr.f32.mxu0 %v1161_v43 }
 0x184   : > { %1625 = vmatmul.mubr.f32.gmra.mrb[50].mxu1 %v1156_v44 }
 0x185   : > { %2075 = vmatmul.mubr.f32.gmra.mrb[50].mxu0 %v1160_v45  ;;  %1629 = vmatprep.mubr.f32.mxu1 %v1165_v46 }
 0x186   : > { %2079 = vmatprep.mubr.f32.mxu0 %v1169_v47 }
 0x188   : > { %1630 = vmatmul.mubr.f32.gmra.mrb[52].mxu1 %v1164_v48 }
 0x189   : > { %2080 = vmatmul.mubr.f32.gmra.mrb[52].mxu0 %v1168_v49  ;;  %1634 = vmatprep.mubr.f32.mxu1 %v1173_v50 }
 0x18a   : > { %2084 = vmatprep.mubr.f32.mxu0 %v1177_v51 }
 0x18c   : > { %1635 = vmatmul.mubr.f32.gmra.mrb[54].mxu1 %v1172_v52 }
 0x18d   : > { %2085 = vmatmul.mubr.f32.gmra.mrb[54].mxu0 %v1176_v53  ;;  %1639 = vmatprep.mubr.f32.mxu1 %v1181_v54 }
 0x18e   : > { %2089 = vmatprep.mubr.f32.mxu0 %v1185_v55 }
 0x190   : > { %1640 = vmatmul.mubr.f32.gmra.mrb[56].mxu1 %v1180_v56 }
 0x191   : > { %2090 = vmatmul.mubr.f32.gmra.mrb[56].mxu0 %v1184_v57  ;;  %1644 = vmatprep.mubr.f32.mxu1 %v1189_v58 }
 0x192   : > { %2094 = vmatprep.mubr.f32.mxu0 %v1193_v59 }
 0x194   : > { %1645 = vmatmul.mubr.f32.gmra.mrb[58].mxu1 %v1188_v60 }
 0x195   : > { %2095 = vmatmul.mubr.f32.gmra.mrb[58].mxu0 %v1192_v61  ;;  %1649 = vmatprep.mubr.f32.mxu1 %v1197_v62 }
 0x196   : > { %2099 = vmatprep.mubr.f32.mxu0 %v1201_v63 }
 0x198   : > { %1650 = vmatmul.mubr.f32.gmra.mrb[60].mxu1 %v1196_v0 }
 0x199   : > { %2100 = vmatmul.mubr.f32.gmra.mrb[60].mxu0 %v1200_v1  ;;  %1654 = vmatprep.mubr.f32.mxu1 %v1205_v3 }
 0x19a   : > { %2104 = vmatprep.mubr.f32.mxu0 %v1209_v4 }
 0x19c   : > { %1655 = vmatmul.mubr.f32.gmra.mrb[62].mxu1 %v1204_v5 }
 0x19d   : > { %2105 = vmatmul.mubr.f32.gmra.mrb[62].mxu0 %v1208_v6 }
 0x1f3   : > { %v1501_v7 = vpop.f32.mrb[0].mxu1 }
 0x1f4   : > { %v1951_v8 = vpop.f32.mrb[0].mxu0  ;;  %v1503_v9 = vpop.f32.mrb[1].mxu1 }
 0x1f5   : > { %v2583_v10 = vadd.f32 %v1951_v8, %v1501_v7  ;;  %v1953_v11 = vpop.f32.mrb[1].mxu0 }
 0x1f7   : > { %2110 = vst [vmem:[%s4117_s8] sm:$0xff] %v2583_v10  ;;  %v1506_v2 = vpop.f32.mrb[2].mxu1 }
 0x1f8   : > { %v1956_v12 = vpop.f32.mrb[2].mxu0  ;;  %v1508_v13 = vpop.f32.mrb[3].mxu1 }
 0x1f9   : > { %v2584_v14 = vadd.f32 %v1956_v12, %v1506_v2  ;;  %v1958_v15 = vpop.f32.mrb[3].mxu0 }
 0x1fb   : > { %2111 = vst [vmem:[%s4117_s8 + $0x8] sm:$0xff] %v2584_v14  ;;  %v1511_v16 = vpop.f32.mrb[4].mxu1 }
 0x1fc   : > { %v1961_v17 = vpop.f32.mrb[4].mxu0  ;;  %v1513_v18 = vpop.f32.mrb[5].mxu1 }
 0x1fd   : > { %v2585_v19 = vadd.f32 %v1961_v17, %v1511_v16  ;;  %v1963_v20 = vpop.f32.mrb[5].mxu0 }
 0x1ff   : > { %2112 = vst [vmem:[%s4117_s8 + $0x10] sm:$0xff] %v2585_v19  ;;  %v1516_v21 = vpop.f32.mrb[6].mxu1 }
 0x200   : > { %v1966_v22 = vpop.f32.mrb[6].mxu0  ;;  %v1518_v23 = vpop.f32.mrb[7].mxu1 }
 0x201   : > { %v2586_v24 = vadd.f32 %v1966_v22, %v1516_v21  ;;  %v1968_v25 = vpop.f32.mrb[7].mxu0 }
 0x203   : > { %2113 = vst [vmem:[%s4117_s8 + $0x18] sm:$0xff] %v2586_v24  ;;  %v1521_v26 = vpop.f32.mrb[8].mxu1 }
 0x204   : > { %v1971_v27 = vpop.f32.mrb[8].mxu0  ;;  %v1523_v28 = vpop.f32.mrb[9].mxu1 }
 0x205   : > { %v2587_v29 = vadd.f32 %v1971_v27, %v1521_v26  ;;  %v1973_v30 = vpop.f32.mrb[9].mxu0 }
 0x207   : > { %2114 = vst [vmem:[%s4117_s8 + $0x20] sm:$0xff] %v2587_v29  ;;  %v1526_v31 = vpop.f32.mrb[10].mxu1 }
 0x208   : > { %v1976_v32 = vpop.f32.mrb[10].mxu0  ;;  %v1528_v33 = vpop.f32.mrb[11].mxu1 }
 0x209   : > { %v2588_v34 = vadd.f32 %v1976_v32, %v1526_v31  ;;  %v1978_v35 = vpop.f32.mrb[11].mxu0 }
 0x20b   : > { %2115 = vst [vmem:[%s4117_s8 + $0x28] sm:$0xff] %v2588_v34  ;;  %v1531_v36 = vpop.f32.mrb[12].mxu1 }
 0x20c   : > { %v1981_v37 = vpop.f32.mrb[12].mxu0  ;;  %v1533_v38 = vpop.f32.mrb[13].mxu1 }
 0x20d   : > { %v2589_v39 = vadd.f32 %v1981_v37, %v1531_v36  ;;  %v1983_v40 = vpop.f32.mrb[13].mxu0 }
 0x20f   : > { %2116 = vst [vmem:[%s4117_s8 + $0x30] sm:$0xff] %v2589_v39  ;;  %v1536_v41 = vpop.f32.mrb[14].mxu1 }
 0x210   : > { %v1986_v42 = vpop.f32.mrb[14].mxu0  ;;  %v1538_v43 = vpop.f32.mrb[15].mxu1 }
 0x211   : > { %v2590_v44 = vadd.f32 %v1986_v42, %v1536_v41  ;;  %v1988_v45 = vpop.f32.mrb[15].mxu0 }
 0x213   : > { %2117 = vst [vmem:[%s4117_s8 + $0x38] sm:$0xff] %v2590_v44  ;;  %v1541_v46 = vpop.f32.mrb[16].mxu1 }
 0x214   : > { %v1991_v47 = vpop.f32.mrb[16].mxu0  ;;  %v1543_v48 = vpop.f32.mrb[17].mxu1 }
 0x215   : > { %v2591_v49 = vadd.f32 %v1991_v47, %v1541_v46  ;;  %v1993_v50 = vpop.f32.mrb[17].mxu0 }
 0x217   : > { %2118 = vst [vmem:[%s4117_s8 + $0x40] sm:$0xff] %v2591_v49  ;;  %v1546_v51 = vpop.f32.mrb[18].mxu1 }
 0x218   : > { %v1996_v52 = vpop.f32.mrb[18].mxu0  ;;  %v1548_v53 = vpop.f32.mrb[19].mxu1 }
 0x219   : > { %v2592_v54 = vadd.f32 %v1996_v52, %v1546_v51  ;;  %v1998_v55 = vpop.f32.mrb[19].mxu0 }
 0x21b   : > { %2119 = vst [vmem:[%s4117_s8 + $0x48] sm:$0xff] %v2592_v54  ;;  %v1551_v56 = vpop.f32.mrb[20].mxu1 }
 0x21c   : > { %v2001_v57 = vpop.f32.mrb[20].mxu0  ;;  %v1553_v58 = vpop.f32.mrb[21].mxu1 }
 0x21d   : > { %v2593_v59 = vadd.f32 %v2001_v57, %v1551_v56  ;;  %v2003_v60 = vpop.f32.mrb[21].mxu0 }
 0x21f   : > { %2120 = vst [vmem:[%s4117_s8 + $0x50] sm:$0xff] %v2593_v59  ;;  %v1556_v61 = vpop.f32.mrb[22].mxu1 }
 0x220   : > { %v2006_v62 = vpop.f32.mrb[22].mxu0  ;;  %v1558_v63 = vpop.f32.mrb[23].mxu1 }
 0x221   : > { %v2594_v0 = vadd.f32 %v2006_v62, %v1556_v61  ;;  %v2008_v1 = vpop.f32.mrb[23].mxu0 }
 0x223   : > { %2121 = vst [vmem:[%s4117_s8 + $0x58] sm:$0xff] %v2594_v0  ;;  %v1561_v3 = vpop.f32.mrb[24].mxu1 }
 0x224   : > { %v2011_v4 = vpop.f32.mrb[24].mxu0  ;;  %v1563_v5 = vpop.f32.mrb[25].mxu1 }
 0x225   : > { %v2595_v6 = vadd.f32 %v2011_v4, %v1561_v3  ;;  %v2013_v7 = vpop.f32.mrb[25].mxu0 }
 0x227   : > { %2122 = vst [vmem:[%s4117_s8 + $0x60] sm:$0xff] %v2595_v6  ;;  %v1566_v8 = vpop.f32.mrb[26].mxu1 }
 0x228   : > { %v2016_v9 = vpop.f32.mrb[26].mxu0  ;;  %v1568_v10 = vpop.f32.mrb[27].mxu1 }
 0x229   : > { %v2596_v11 = vadd.f32 %v2016_v9, %v1566_v8  ;;  %v2018_v2 = vpop.f32.mrb[27].mxu0 }
 0x22b   : > { %2123 = vst [vmem:[%s4117_s8 + $0x68] sm:$0xff] %v2596_v11  ;;  %v1571_v12 = vpop.f32.mrb[28].mxu1 }
 0x22c   : > { %v2021_v13 = vpop.f32.mrb[28].mxu0  ;;  %v1573_v14 = vpop.f32.mrb[29].mxu1 }
 0x22d   : > { %v2597_v15 = vadd.f32 %v2021_v13, %v1571_v12  ;;  %v2023_v16 = vpop.f32.mrb[29].mxu0 }
 0x22f   : > { %2124 = vst [vmem:[%s4117_s8 + $0x70] sm:$0xff] %v2597_v15  ;;  %v1576_v17 = vpop.f32.mrb[30].mxu1 }
 0x230   : > { %v2026_v18 = vpop.f32.mrb[30].mxu0  ;;  %v1578_v19 = vpop.f32.mrb[31].mxu1 }
 0x231   : > { %v2598_v20 = vadd.f32 %v2026_v18, %v1576_v17  ;;  %v2028_v21 = vpop.f32.mrb[31].mxu0 }
 0x233   : > { %2125 = vst [vmem:[%s4117_s8 + $0x78] sm:$0xff] %v2598_v20  ;;  %v1581_v22 = vpop.f32.mrb[32].mxu1 }
 0x234   : > { %v2031_v23 = vpop.f32.mrb[32].mxu0  ;;  %v1583_v24 = vpop.f32.mrb[33].mxu1 }
 0x235   : > { %v2599_v25 = vadd.f32 %v2031_v23, %v1581_v22  ;;  %v2033_v26 = vpop.f32.mrb[33].mxu0 }
 0x237   : > { %2126 = vst [vmem:[%s4117_s8 + $0x80] sm:$0xff] %v2599_v25  ;;  %v1586_v27 = vpop.f32.mrb[34].mxu1 }
 0x238   : > { %v2036_v28 = vpop.f32.mrb[34].mxu0  ;;  %v1588_v29 = vpop.f32.mrb[35].mxu1 }
 0x239   : > { %v2600_v30 = vadd.f32 %v2036_v28, %v1586_v27  ;;  %v2038_v31 = vpop.f32.mrb[35].mxu0 }
 0x23b   : > { %2127 = vst [vmem:[%s4117_s8 + $0x88] sm:$0xff] %v2600_v30  ;;  %v1591_v32 = vpop.f32.mrb[36].mxu1 }
 0x23c   : > { %v2041_v33 = vpop.f32.mrb[36].mxu0  ;;  %v1593_v34 = vpop.f32.mrb[37].mxu1 }
 0x23d   : > { %v2601_v35 = vadd.f32 %v2041_v33, %v1591_v32  ;;  %v2043_v36 = vpop.f32.mrb[37].mxu0 }
 0x23f   : > { %2128 = vst [vmem:[%s4117_s8 + $0x90] sm:$0xff] %v2601_v35  ;;  %v1596_v37 = vpop.f32.mrb[38].mxu1 }
 0x240   : > { %v2046_v38 = vpop.f32.mrb[38].mxu0  ;;  %v1598_v39 = vpop.f32.mrb[39].mxu1 }
 0x241   : > { %v2602_v40 = vadd.f32 %v2046_v38, %v1596_v37  ;;  %v2048_v41 = vpop.f32.mrb[39].mxu0  ;;  %v2242_v38 = vld [vmem:[%s4117_s8] sm:$0xff] (%p2875_p6)  ;;  %v2244_v39 = vld [vmem:[%s4117_s8 + $0x8] sm:$0xff] (%p2875_p6) }
 0x242   : > { %v2248_v41 = vld [vmem:[%s4117_s8 + $0x18] sm:$0xff] (%p2875_p6)  ;;  %2243 = vst [vmem:[%s4160_s16] sm:$0xff] (%p2875_p6), %v2242_v38  ;;  %2245 = vst [vmem:[%s4160_s16 + $0x10] sm:$0xff] (%p2875_p6), %v2244_v39 }
 0x243   : > { %2129 = vst [vmem:[%s4117_s8 + $0x98] sm:$0xff] %v2602_v40  ;;  %v1601_v42 = vpop.f32.mrb[40].mxu1  ;;  %v2246_v40 = vld [vmem:[%s4117_s8 + $0x10] sm:$0xff] (%p2875_p6)  ;;  %2249 = vst [vmem:[%s4160_s16 + $0x30] sm:$0xff] (%p2875_p6), %v2248_v41 }
 0x244   : > { %v2051_v43 = vpop.f32.mrb[40].mxu0  ;;  %v1603_v44 = vpop.f32.mrb[41].mxu1  ;;  %2247 = vst [vmem:[%s4160_s16 + $0x20] sm:$0xff] (%p2875_p6), %v2246_v40 }
 0x245   : > { %v2603_v45 = vadd.f32 %v2051_v43, %v1601_v42  ;;  %v2053_v46 = vpop.f32.mrb[41].mxu0  ;;  %v2250_v42 = vld [vmem:[%s4117_s8 + $0x20] sm:$0xff] (%p2875_p6)  ;;  %v2252_v43 = vld [vmem:[%s4117_s8 + $0x28] sm:$0xff] (%p2875_p6)  ;;  %v2254_v44 = vld [vmem:[%s4117_s8 + $0x30] sm:$0xff] (%p2875_p6) }
 0x246   : > { %2251 = vst [vmem:[%s4160_s16 + $0x40] sm:$0xff] (%p2875_p6), %v2250_v42  ;;  %2253 = vst [vmem:[%s4160_s16 + $0x50] sm:$0xff] (%p2875_p6), %v2252_v43  ;;  %v2258_v46 = vld [vmem:[%s4117_s8 + $0x40] sm:$0xff] (%p2875_p6) }
 0x247   : > { %2130 = vst [vmem:[%s4117_s8 + $0xa0] sm:$0xff] %v2603_v45  ;;  %v1606_v47 = vpop.f32.mrb[42].mxu1  ;;  %v2256_v45 = vld [vmem:[%s4117_s8 + $0x38] sm:$0xff] (%p2875_p6)  ;;  %2255 = vst [vmem:[%s4160_s16 + $0x60] sm:$0xff] (%p2875_p6), %v2254_v44 }
 0x248   : > { %v2056_v48 = vpop.f32.mrb[42].mxu0  ;;  %v1608_v49 = vpop.f32.mrb[43].mxu1  ;;  %2257 = vst [vmem:[%s4160_s16 + $0x70] sm:$0xff] (%p2875_p6), %v2256_v45  ;;  %2259 = vst [vmem:[%s4160_s16 + $0x80] sm:$0xff] (%p2875_p6), %v2258_v46 }
 0x249   : > { %v2604_v50 = vadd.f32 %v2056_v48, %v1606_v47  ;;  %v2058_v51 = vpop.f32.mrb[43].mxu0  ;;  %v2260_v47 = vld [vmem:[%s4117_s8 + $0x48] sm:$0xff] (%p2875_p6)  ;;  %v2262_v48 = vld [vmem:[%s4117_s8 + $0x50] sm:$0xff] (%p2875_p6)  ;;  %v2264_v49 = vld [vmem:[%s4117_s8 + $0x58] sm:$0xff] (%p2875_p6) }
 0x24a   : > { %2261 = vst [vmem:[%s4160_s16 + $0x90] sm:$0xff] (%p2875_p6), %v2260_v47  ;;  %2263 = vst [vmem:[%s4160_s16 + $0xa0] sm:$0xff] (%p2875_p6), %v2262_v48  ;;  %v2268_v51 = vld [vmem:[%s4117_s8 + $0x68] sm:$0xff] (%p2875_p6) }
 0x24b   : > { %2131 = vst [vmem:[%s4117_s8 + $0xa8] sm:$0xff] %v2604_v50  ;;  %v1611_v52 = vpop.f32.mrb[44].mxu1  ;;  %2265 = vst [vmem:[%s4160_s16 + $0xb0] sm:$0xff] (%p2875_p6), %v2264_v49  ;;  %v2266_v50 = vld [vmem:[%s4117_s8 + $0x60] sm:$0xff] (%p2875_p6) }
 0x24c   : > { %v2061_v53 = vpop.f32.mrb[44].mxu0  ;;  %v1613_v54 = vpop.f32.mrb[45].mxu1  ;;  %2267 = vst [vmem:[%s4160_s16 + $0xc0] sm:$0xff] (%p2875_p6), %v2266_v50  ;;  %2269 = vst [vmem:[%s4160_s16 + $0xd0] sm:$0xff] (%p2875_p6), %v2268_v51 }
 0x24d   : > { %v2605_v55 = vadd.f32 %v2061_v53, %v1611_v52  ;;  %v2063_v56 = vpop.f32.mrb[45].mxu0  ;;  %v2270_v52 = vld [vmem:[%s4117_s8 + $0x70] sm:$0xff] (%p2875_p6)  ;;  %v2272_v53 = vld [vmem:[%s4117_s8 + $0x78] sm:$0xff] (%p2875_p6)  ;;  %v2274_v54 = vld [vmem:[%s4117_s8 + $0x80] sm:$0xff] (%p2875_p6) }
 0x24e   : > { %2271 = vst [vmem:[%s4160_s16 + $0xe0] sm:$0xff] (%p2875_p6), %v2270_v52  ;;  %2273 = vst [vmem:[%s4160_s16 + $0xf0] sm:$0xff] (%p2875_p6), %v2272_v53  ;;  %v2278_v56 = vld [vmem:[%s4117_s8 + $0x90] sm:$0xff] (%p2875_p6) }
 0x24f   : > { %2132 = vst [vmem:[%s4117_s8 + $0xb0] sm:$0xff] %v2605_v55  ;;  %v1616_v57 = vpop.f32.mrb[46].mxu1  ;;  %v2276_v55 = vld [vmem:[%s4117_s8 + $0x88] sm:$0xff] (%p2875_p6)  ;;  %2275 = vst [vmem:[%s4160_s16 + $0x100] sm:$0xff] (%p2875_p6), %v2274_v54 }
 0x250   : > { %v2066_v58 = vpop.f32.mrb[46].mxu0  ;;  %v1618_v59 = vpop.f32.mrb[47].mxu1  ;;  %2277 = vst [vmem:[%s4160_s16 + $0x110] sm:$0xff] (%p2875_p6), %v2276_v55  ;;  %2279 = vst [vmem:[%s4160_s16 + $0x120] sm:$0xff] (%p2875_p6), %v2278_v56 }
 0x251   : > { %v2606_v60 = vadd.f32 %v2066_v58, %v1616_v57  ;;  %v2068_v61 = vpop.f32.mrb[47].mxu0  ;;  %v2280_v57 = vld [vmem:[%s4117_s8 + $0x98] sm:$0xff] (%p2875_p6)  ;;  %v2282_v58 = vld [vmem:[%s4117_s8 + $0xa0] sm:$0xff] (%p2875_p6) }
 0x252   : > { %2281 = vst [vmem:[%s4160_s16 + $0x130] sm:$0xff] (%p2875_p6), %v2280_v57  ;;  %2283 = vst [vmem:[%s4160_s16 + $0x140] sm:$0xff] (%p2875_p6), %v2282_v58  ;;  %v2284_v59 = vld [vmem:[%s4117_s8 + $0xa8] sm:$0xff] (%p2875_p6) }
 0x253   : > { %2133 = vst [vmem:[%s4117_s8 + $0xb8] sm:$0xff] %v2606_v60  ;;  %v1621_v62 = vpop.f32.mrb[48].mxu1  ;;  %2285 = vst [vmem:[%s4160_s16 + $0x150] sm:$0xff] (%p2875_p6), %v2284_v59 }
 0x254   : > { %v2071_v63 = vpop.f32.mrb[48].mxu0  ;;  %v1623_v0 = vpop.f32.mrb[49].mxu1 }
 0x255   : > { %v2607_v1 = vadd.f32 %v2071_v63, %v1621_v62  ;;  %v2073_v3 = vpop.f32.mrb[49].mxu0 }
 0x256   : > { %v2286_v60 = vld [vmem:[%s4117_s8 + $0xb0] sm:$0xff] (%p2875_p6) }
 0x257   : > { %2134 = vst [vmem:[%s4117_s8 + $0xc0] sm:$0xff] %v2607_v1  ;;  %v1626_v4 = vpop.f32.mrb[50].mxu1  ;;  %2287 = vst [vmem:[%s4160_s16 + $0x160] sm:$0xff] (%p2875_p6), %v2286_v60 }
 0x258   : > { %v2076_v5 = vpop.f32.mrb[50].mxu0  ;;  %v1628_v6 = vpop.f32.mrb[51].mxu1 }
 0x259   : > { %v2608_v7 = vadd.f32 %v2076_v5, %v1626_v4  ;;  %v2078_v8 = vpop.f32.mrb[51].mxu0 }
 0x25a   : > { %v2288_v61 = vld [vmem:[%s4117_s8 + $0xb8] sm:$0xff] (%p2875_p6) }
 0x25b   : > { %2135 = vst [vmem:[%s4117_s8 + $0xc8] sm:$0xff] %v2608_v7  ;;  %v1631_v9 = vpop.f32.mrb[52].mxu1  ;;  %2289 = vst [vmem:[%s4160_s16 + $0x170] sm:$0xff] (%p2875_p6), %v2288_v61 }
 0x25c   : > { %v2081_v10 = vpop.f32.mrb[52].mxu0  ;;  %v1633_v11 = vpop.f32.mrb[53].mxu1 }
 0x25d   : > { %v2609_v2 = vadd.f32 %v2081_v10, %v1631_v9  ;;  %v2083_v12 = vpop.f32.mrb[53].mxu0 }
 0x25e   : > { %v2290_v62 = vld [vmem:[%s4117_s8 + $0xc0] sm:$0xff] (%p2875_p6) }
 0x25f   : > { %2136 = vst [vmem:[%s4117_s8 + $0xd0] sm:$0xff] %v2609_v2  ;;  %v1636_v13 = vpop.f32.mrb[54].mxu1  ;;  %2291 = vst [vmem:[%s4160_s16 + $0x180] sm:$0xff] (%p2875_p6), %v2290_v62 }
 0x260   : > { %v2086_v14 = vpop.f32.mrb[54].mxu0  ;;  %v1638_v15 = vpop.f32.mrb[55].mxu1 }
 0x261   : > { %v2610_v16 = vadd.f32 %v2086_v14, %v1636_v13  ;;  %v2088_v17 = vpop.f32.mrb[55].mxu0 }
 0x262   : > { %v2292_v63 = vld [vmem:[%s4117_s8 + $0xc8] sm:$0xff] (%p2875_p6) }
 0x263   : > { %2137 = vst [vmem:[%s4117_s8 + $0xd8] sm:$0xff] %v2610_v16  ;;  %v1641_v18 = vpop.f32.mrb[56].mxu1  ;;  %2293 = vst [vmem:[%s4160_s16 + $0x190] sm:$0xff] (%p2875_p6), %v2292_v63 }
 0x264   : > { %v2091_v19 = vpop.f32.mrb[56].mxu0  ;;  %v1643_v20 = vpop.f32.mrb[57].mxu1 }
 0x265   : > { %v2611_v21 = vadd.f32 %v2091_v19, %v1641_v18  ;;  %v2093_v22 = vpop.f32.mrb[57].mxu0 }
 0x266   : > { %v2294_v0 = vld [vmem:[%s4117_s8 + $0xd0] sm:$0xff] (%p2875_p6) }
 0x267   : > { %2138 = vst [vmem:[%s4117_s8 + $0xe0] sm:$0xff] %v2611_v21  ;;  %v1646_v23 = vpop.f32.mrb[58].mxu1  ;;  %2295 = vst [vmem:[%s4160_s16 + $0x1a0] sm:$0xff] (%p2875_p6), %v2294_v0 }
 0x268   : > { %v2096_v24 = vpop.f32.mrb[58].mxu0  ;;  %v1648_v25 = vpop.f32.mrb[59].mxu1 }
 0x269   : > { %v2612_v26 = vadd.f32 %v2096_v24, %v1646_v23  ;;  %v2098_v27 = vpop.f32.mrb[59].mxu0 }
 0x26a   : > { %v2296_v1 = vld [vmem:[%s4117_s8 + $0xd8] sm:$0xff] (%p2875_p6) }
 0x26b   : > { %2139 = vst [vmem:[%s4117_s8 + $0xe8] sm:$0xff] %v2612_v26  ;;  %v1651_v28 = vpop.f32.mrb[60].mxu1  ;;  %2297 = vst [vmem:[%s4160_s16 + $0x1b0] sm:$0xff] (%p2875_p6), %v2296_v1 }
 0x26c   : > { %v2101_v29 = vpop.f32.mrb[60].mxu0  ;;  %v1653_v30 = vpop.f32.mrb[61].mxu1 }
 0x26d   : > { %v2613_v31 = vadd.f32 %v2101_v29, %v1651_v28  ;;  %v2103_v32 = vpop.f32.mrb[61].mxu0  ;;  %2148 = sbr.rel (!%p2875_p6) target bundleno = 636 (0x27c), region = 70 }
 0x26e   : > { %v2298_v3 = vld [vmem:[%s4117_s8 + $0xe0] sm:$0xff] (%p2875_p6) }
 0x26f   : > { %2140 = vst [vmem:[%s4117_s8 + $0xf0] sm:$0xff] %v2613_v31  ;;  %v1656_v33 = vpop.f32.mrb[62].mxu1  ;;  %2299 = vst [vmem:[%s4160_s16 + $0x1c0] sm:$0xff] (%p2875_p6), %v2298_v3 }
 0x270   : > { %v2106_v34 = vpop.f32.mrb[62].mxu0  ;;  %v1658_v35 = vpop.f32.mrb[63].mxu1 }
 0x271   : > { %v2614_v36 = vadd.f32 %v2106_v34, %v1656_v33  ;;  %v2108_v37 = vpop.f32.mrb[63].mxu0 }
 0x272   : > { %v2300_v4 = vld [vmem:[%s4117_s8 + $0xe8] sm:$0xff] (%p2875_p6) }
 0x273   : > { %2141 = vst [vmem:[%s4117_s8 + $0xf8] sm:$0xff] %v2614_v36  ;;  %2301 = vst [vmem:[%s4160_s16 + $0x1d0] sm:$0xff] (%p2875_p6), %v2300_v4 }
 0x276   : > { %v2302_v5 = vld [vmem:[%s4117_s8 + $0xf0] sm:$0xff] }
 0x277   : > { %2303 = vst [vmem:[%s4160_s16 + $0x1e0] sm:$0xff] %v2302_v5 }
 0x27a   : > { %v2304_v6 = vld [vmem:[%s4117_s8 + $0xf8] sm:$0xff] }
 0x27b   : > { %2305 = vst [vmem:[%s4160_s16 + $0x1f0] sm:$0xff] %v2304_v6 }
 0x27c PF: > { %s12_s13 = sadd.s32 1, %s2822_s13   ;;  %s4242_s9 = smov %s2810_s10 }
 0x27d   : > { %p9_p11 = scmp.ge.s32.totalorder %s12_s13, 4   ;;  %s4243_s10 = smov %s2880_s19 }
 0x27e   : > { %s4244_s11 = smov %s2818_s12  ;;  %s4245_s12 = smov %s4247_s14 }
 0x27f   :  { %11 = sbr.rel (!%p9_p11) target bundleno = 3 (0x3), region = 139 }

</bundles_post_ra>
